<compile_context>
chip_gen: v7x
topology: tpu7x:2x2x1
jax: 0.10.0
libtpu: 0.0.40
codegen_flags: <defaults>
</compile_context>

<pallas_src>
import functools
import math

import jax
import jax.numpy as jnp
from jax import lax
from jax.experimental import pallas as pl
from jax.experimental.pallas import tpu as pltpu

LN_EPS = 1e-5                      # PyTorch nn.LayerNorm default
NEG_INF = -1e30
HIGHEST = jax.lax.Precision.HIGHEST


def _transformer_block_kernel(
    x_ref,          # (rows, D)   rows = batch_block * T (flattened batch chunk)
    w_qkv_ref,      # (D, 3D)     columns: [Wq | Wk | Wv], head h at lanes [h*hd,(h+1)*hd)
    ln1_g_ref,      # (1, D)
    ln1_b_ref,      # (1, D)
    ln2_g_ref,      # (1, D)
    ln2_b_ref,      # (1, D)
    w_up_ref,       # (D, 4D)
    b_up_ref,       # (1, 4D)
    w_down_ref,     # (4D, D)
    b_down_ref,     # (1, D)
    o_ref,          # (rows, D)
    attn_scr,       # VMEM (rows, D) f32 — per-head outputs land here (no concat)
    *,
    num_heads: int,
    seq_len: int,
):
    x = x_ref[...]                           # (rows, D) f32
    rows, D = x.shape
    T = seq_len
    bb = rows // T                           # batch elements in this block
    hd = D // num_heads

    def layer_norm(v, g_ref, b_ref):
        mu = jnp.mean(v, axis=-1, keepdims=True)
        var = jnp.mean((v - mu) ** 2, axis=-1, keepdims=True)
        return (v - mu) * lax.rsqrt(var + LN_EPS) * g_ref[...] + b_ref[...]

    # ---- LayerNorm 1 + fused QKV projection (one wide MXU push) ----
    xn = layer_norm(x, ln1_g_ref, ln1_b_ref)
    qkv = jnp.dot(xn, w_qkv_ref[...],
                  preferred_element_type=jnp.float32, precision=HIGHEST)   # (rows, 3D)

    # Causal mask per batch element, (1, T, T) — no cross-batch blocks exist at all.
    q_idx = lax.broadcasted_iota(jnp.int32, (1, T, T), 1)
    k_idx = lax.broadcasted_iota(jnp.int32, (1, T, T), 2)
    causal = q_idx >= k_idx
    inv_sqrt_hd = 1.0 / math.sqrt(hd)

    for h in range(num_heads):               # static unroll over heads
        lo = h * hd
        qh = qkv[:, lo:lo + hd].reshape(bb, T, hd)
        kh = qkv[:, D + lo:D + lo + hd].reshape(bb, T, hd)
        vh = qkv[:, 2 * D + lo:2 * D + lo + hd].reshape(bb, T, hd)

        # batch-batched score / softmax / PV: (bb, T, T) instead of (rows, rows)
        s = jnp.einsum("bqd,bkd->bqk", qh, kh,
                       preferred_element_type=jnp.float32,
                       precision=HIGHEST) * inv_sqrt_hd
        s = jnp.where(causal, s, NEG_INF)
        s = s - jnp.max(s, axis=-1, keepdims=True)
        p = jnp.exp(s)
        p = p / jnp.sum(p, axis=-1, keepdims=True)       # exact divide (torch parity)
        oh = jnp.einsum("bqk,bkd->bqd", p, vh,
                        preferred_element_type=jnp.float32, precision=HIGHEST)
        # head output lands at its static lane offset — no jnp.concatenate
        attn_scr[:, lo:lo + hd] = oh.reshape(rows, hd)

    first = x + attn_scr[...]

    # ---- LayerNorm 2 + feed-forward (Linear -> ReLU -> Linear) ----
    fn = layer_norm(first, ln2_g_ref, ln2_b_ref)
    h1 = jnp.dot(fn, w_up_ref[...],
                 preferred_element_type=jnp.float32, precision=HIGHEST) + b_up_ref[...]
    h1 = jnp.maximum(h1, 0.0)
    ff = jnp.dot(h1, w_down_ref[...],
                 preferred_element_type=jnp.float32, precision=HIGHEST) + b_down_ref[...]

    out = first + ff
    o_ref[...] = jnp.round(out * 1e4) / 1e4     # torch.round(result, decimals=4)


def prepare_params(params):
    """One-time packing: per-head (H, D, hd) Q/K/V weights -> one (D, 3D) matrix.

    Done once at parameter-init time so the per-forward wrapper issues no extra
    transpose/concat XLA ops in front of the kernel.
    """
    def pack(w):                      # (H, D, hd) -> (D, H*hd), head h at cols [h*hd,(h+1)*hd)
        H, d, hd = w.shape
        return jnp.transpose(w, (1, 0, 2)).reshape(d, H * hd)

    packed = {k: v for k, v in params.items() if k not in ("wq", "wk", "wv")}
    packed["w_qkv"] = jnp.concatenate(
        [pack(params["wq"]), pack(params["wk"]), pack(params["wv"])], axis=1)
    return packed


def transformer_block(x, packed_params, *, num_heads: int, batch_block: int | None = None):
    B, T, D = x.shape
    ff_dim = packed_params["w_up"].shape[1]

    # Default: one grid step over the whole batch.  At toy sizes (rows = B*T = 16)
    # this avoids per-step overhead and duplicated weight DMA; for large B*T pass a
    # smaller batch_block so x/out block DMAs pipeline (weights stay resident —
    # constant index maps).
    if batch_block is None:
        batch_block = B
    assert B % batch_block == 0
    n_steps = B // batch_block
    rows = batch_block * T

    x2 = x.reshape(B * T, D)          # contiguous (B*T, D) slab in / out

    full = lambda shape: pl.BlockSpec(shape, lambda i: (0, 0))
    kernel = functools.partial(_transformer_block_kernel,
                               num_heads=num_heads, seq_len=T)

    out2 = pl.pallas_call(
        kernel,
        out_shape=jax.ShapeDtypeStruct((B * T, D), jnp.float32),
        grid_spec=pltpu.PrefetchScalarGridSpec(
            num_scalar_prefetch=0,
            grid=(n_steps,),
            in_specs=[
                pl.BlockSpec((rows, D), lambda i: (i, 0)),   # x (flattened batch chunk)
                full((D, 3 * D)),                            # fused W_qkv
                full((1, D)), full((1, D)),                  # ln1 gamma/beta
                full((1, D)), full((1, D)),                  # ln2 gamma/beta
                full((D, ff_dim)), full((1, ff_dim)),        # W_up / b_up
                full((ff_dim, D)), full((1, D)),             # W_down / b_down
            ],
            out_specs=pl.BlockSpec((rows, D), lambda i: (i, 0)),
            scratch_shapes=[pltpu.VMEM((rows, D), jnp.float32)],
        ),
        compiler_params=pltpu.CompilerParams(
            dimension_semantics=("parallel",),
            vmem_limit_bytes=32 * 1024 * 1024,
        ),
    )(
        x2, packed_params["w_qkv"],
        packed_params["ln1_g"], packed_params["ln1_b"],
        packed_params["ln2_g"], packed_params["ln2_b"],
        packed_params["w_up"], packed_params["b_up"],
        packed_params["w_down"], packed_params["b_down"],
    )
    return out2.reshape(B, T, D)


def _reference(x, params, num_heads):
    """Pure-JAX reference (mirrors the torch module), f32 HIGHEST precision."""
    B, T, D = x.shape
    hd = D // num_heads
    mm = functools.partial(jnp.matmul, precision=HIGHEST)

    def ln(v, g, b):
        mu = jnp.mean(v, axis=-1, keepdims=True)
        var = jnp.mean((v - mu) ** 2, axis=-1, keepdims=True)
        return (v - mu) * jax.lax.rsqrt(var + LN_EPS) * g + b

    xn = ln(x, params["ln1_g"], params["ln1_b"])
    causal = jnp.tril(jnp.ones((T, T), dtype=bool))
    heads = []
    for h in range(num_heads):
        q = mm(xn, params["wq"][h])
        k = mm(xn, params["wk"][h])
        v = mm(xn, params["wv"][h])
        s = mm(q, jnp.swapaxes(k, -1, -2)) / math.sqrt(hd)
        s = jnp.where(causal, s, -jnp.inf)
        p = jax.nn.softmax(s, axis=-1)
        heads.append(mm(p, v))
    first = x + jnp.concatenate(heads, axis=-1)
    fn = ln(first, params["ln2_g"], params["ln2_b"])
    ff = mm(jnp.maximum(mm(fn, params["w_up"]) + params["b_up"], 0.0),
            params["w_down"]) + params["b_down"]
    return jnp.round((first + ff) * 1e4) / 1e4


if __name__ == "__main__":
    B, T, D = 2, 8, 32          # batch, seq, attention_dim
    NUM_HEADS = 4
    HD = D // NUM_HEADS
    FF = 4 * D

    key = jax.random.PRNGKey(0)
    ks = jax.random.split(key, 8)
    scale = 1.0 / math.sqrt(D)

    params = {
        # per-head Q/K/V projection weights (no bias), shape (H, D, head_dim)
        "wq": jax.random.normal(ks[0], (NUM_HEADS, D, HD), jnp.float32) * scale,
        "wk": jax.random.normal(ks[1], (NUM_HEADS, D, HD), jnp.float32) * scale,
        "wv": jax.random.normal(ks[2], (NUM_HEADS, D, HD), jnp.float32) * scale,
        # LayerNorm affine params (PyTorch default init: gamma=1, beta=0)
        "ln1_g": jnp.ones((1, D), jnp.float32),
        "ln1_b": jnp.zeros((1, D), jnp.float32),
        "ln2_g": jnp.ones((1, D), jnp.float32),
        "ln2_b": jnp.zeros((1, D), jnp.float32),
        # feed-forward (VanillaNN): Linear(D->4D), ReLU, Linear(4D->D)
        "w_up": jax.random.normal(ks[3], (D, FF), jnp.float32) * scale,
        "b_up": jax.random.normal(ks[4], (1, FF), jnp.float32) * 0.01,
        "w_down": jax.random.normal(ks[5], (FF, D), jnp.float32) / math.sqrt(FF),
        "b_down": jax.random.normal(ks[6], (1, D), jnp.float32) * 0.01,
    }

    x = jax.random.normal(ks[7], (B, T, D), jnp.float32)

    packed_params = prepare_params(params)     # QKV weight packing happens ONCE here

    out = transformer_block(x, packed_params, num_heads=NUM_HEADS)
    out = jax.block_until_ready(out)

    ref = _reference(x, params, NUM_HEADS)
    assert out.shape == (B, T, D)
    # Both sides use exact-division softmax + HIGHEST-precision f32 matmuls; the
    # only remaining divergence is accumulation order, which after rounding to 4
    # decimals is at most ~1e-4 at tie boundaries.
    assert jnp.max(jnp.abs(out - ref)) < 2e-3, "mismatch vs pure-JAX reference"

    print("KERNEL_OK")
</pallas_src>

<mosaic_0001>
module attributes {stable_mosaic.version = 11 : i64} {
  func.func @_transformer_block_kernel(%arg0: i32, %arg1: memref<16x32xf32, #tpu.memory_space<vmem>>, %arg2: memref<32x96xf32, #tpu.memory_space<vmem>>, %arg3: memref<1x32xf32, #tpu.memory_space<vmem>>, %arg4: memref<1x32xf32, #tpu.memory_space<vmem>>, %arg5: memref<1x32xf32, #tpu.memory_space<vmem>>, %arg6: memref<1x32xf32, #tpu.memory_space<vmem>>, %arg7: memref<32x128xf32, #tpu.memory_space<vmem>>, %arg8: memref<1x128xf32, #tpu.memory_space<vmem>>, %arg9: memref<128x32xf32, #tpu.memory_space<vmem>>, %arg10: memref<1x32xf32, #tpu.memory_space<vmem>>, %arg11: memref<16x32xf32, #tpu.memory_space<vmem>>, %arg12: memref<16x32xf32, #tpu.memory_space<vmem>>) attributes {dimension_semantics = [#tpu.dimension_semantics<parallel>], iteration_bounds = array<i64: 1>, scalar_prefetch = 0 : i64, scratch_operands = 1 : i64, tpu.core_type = #tpu.core_type<tc>, window_params = [{transform_indices = @transform_0, window_bounds = array<i64: 16, 32>}, {pipeline_mode = #tpu.pipeline_mode<synchronous>, transform_indices = @transform_1, window_bounds = array<i64: 32, 96>}, {pipeline_mode = #tpu.pipeline_mode<synchronous>, transform_indices = @transform_2, window_bounds = array<i64: 1, 32>}, {pipeline_mode = #tpu.pipeline_mode<synchronous>, transform_indices = @transform_3, window_bounds = array<i64: 1, 32>}, {pipeline_mode = #tpu.pipeline_mode<synchronous>, transform_indices = @transform_4, window_bounds = array<i64: 1, 32>}, {pipeline_mode = #tpu.pipeline_mode<synchronous>, transform_indices = @transform_5, window_bounds = array<i64: 1, 32>}, {pipeline_mode = #tpu.pipeline_mode<synchronous>, transform_indices = @transform_6, window_bounds = array<i64: 32, 128>}, {pipeline_mode = #tpu.pipeline_mode<synchronous>, transform_indices = @transform_7, window_bounds = array<i64: 1, 128>}, {pipeline_mode = #tpu.pipeline_mode<synchronous>, transform_indices = @transform_8, window_bounds = array<i64: 128, 32>}, {pipeline_mode = #tpu.pipeline_mode<synchronous>, transform_indices = @transform_9, window_bounds = array<i64: 1, 32>}, {transform_indices = @transform_10, window_bounds = array<i64: 16, 32>}]} {
    %c0 = arith.constant 0 : index
    %c0_0 = arith.constant 0 : index
    %0 = vector.load %arg1[%c0, %c0_0] : memref<16x32xf32, #tpu.memory_space<vmem>>, vector<16x32xf32>
    %cst = arith.constant dense<0.000000e+00> : vector<16xf32>
    %1 = vector.multi_reduction <add>, %0, %cst [1] : vector<16x32xf32> to vector<16xf32>
    %2 = vector.shape_cast %1 : vector<16xf32> to vector<16x1xf32>
    %cst_1 = arith.constant 3.200000e+01 : f32
    %3 = vector.broadcast %cst_1 : f32 to vector<16x1xf32>
    %4 = arith.divf %2, %3 : vector<16x1xf32>
    %5 = vector.broadcast %4 : vector<16x1xf32> to vector<16x32xf32>
    %6 = arith.subf %0, %5 : vector<16x32xf32>
    %7 = arith.mulf %6, %6 : vector<16x32xf32>
    %cst_2 = arith.constant dense<0.000000e+00> : vector<16xf32>
    %8 = vector.multi_reduction <add>, %7, %cst_2 [1] : vector<16x32xf32> to vector<16xf32>
    %9 = vector.shape_cast %8 : vector<16xf32> to vector<16x1xf32>
    %cst_3 = arith.constant 3.200000e+01 : f32
    %10 = vector.broadcast %cst_3 : f32 to vector<16x1xf32>
    %11 = arith.divf %9, %10 : vector<16x1xf32>
    %12 = vector.broadcast %4 : vector<16x1xf32> to vector<16x32xf32>
    %13 = arith.subf %0, %12 : vector<16x32xf32>
    %cst_4 = arith.constant 9.99999974E-6 : f32
    %14 = vector.broadcast %cst_4 : f32 to vector<16x1xf32>
    %15 = arith.addf %11, %14 : vector<16x1xf32>
    %16 = math.rsqrt %15 : vector<16x1xf32>
    %17 = vector.broadcast %16 : vector<16x1xf32> to vector<16x32xf32>
    %18 = arith.mulf %13, %17 : vector<16x32xf32>
    %c0_5 = arith.constant 0 : index
    %c0_6 = arith.constant 0 : index
    %19 = vector.load %arg3[%c0_5, %c0_6] : memref<1x32xf32, #tpu.memory_space<vmem>>, vector<1x32xf32>
    %20 = vector.broadcast %19 : vector<1x32xf32> to vector<16x32xf32>
    %21 = arith.mulf %18, %20 : vector<16x32xf32>
    %c0_7 = arith.constant 0 : index
    %c0_8 = arith.constant 0 : index
    %22 = vector.load %arg4[%c0_7, %c0_8] : memref<1x32xf32, #tpu.memory_space<vmem>>, vector<1x32xf32>
    %23 = vector.broadcast %22 : vector<1x32xf32> to vector<16x32xf32>
    %24 = arith.addf %21, %23 : vector<16x32xf32>
    %c0_9 = arith.constant 0 : index
    %c0_10 = arith.constant 0 : index
    %25 = vector.load %arg2[%c0_9, %c0_10] : memref<32x96xf32, #tpu.memory_space<vmem>>, vector<32x96xf32>
    %cst_11 = arith.constant dense<0.000000e+00> : vector<16x96xf32>
    %26 = tpu.matmul %24, %25, %cst_11 {dimension_numbers = #tpu.dot_dimension_numbers<[1], [0], [0], [1], [0, 0, 1, 1], [], []>, precision = #tpu.contract_precision<fp32>} : vector<16x32xf32>, vector<32x96xf32>, vector<16x96xf32> -> vector<16x96xf32>
    %27 = tpu.iota {dimensions = array<i32: 1>} : vector<1x8x8xi32>
    %28 = tpu.iota {dimensions = array<i32: 2>} : vector<1x8x8xi32>
    %29 = arith.cmpi sge, %27, %28 : vector<1x8x8xi32>
    %30 = vector.extract_strided_slice %26 {offsets = [0, 0], sizes = [16, 8], strides = [1, 1]} : vector<16x96xf32> to vector<16x8xf32>
    %31 = vector.shape_cast %30 : vector<16x8xf32> to vector<2x8x8xf32>
    %32 = vector.extract_strided_slice %26 {offsets = [0, 32], sizes = [16, 8], strides = [1, 1]} : vector<16x96xf32> to vector<16x8xf32>
    %33 = vector.shape_cast %32 : vector<16x8xf32> to vector<2x8x8xf32>
    %34 = vector.extract_strided_slice %26 {offsets = [0, 64], sizes = [16, 8], strides = [1, 1]} : vector<16x96xf32> to vector<16x8xf32>
    %35 = vector.shape_cast %34 : vector<16x8xf32> to vector<2x8x8xf32>
    "tpu.trace_start"() <{level = 10 : i32, message = "bqd,bkd->bqk"}> : () -> ()
    %cst_12 = arith.constant dense<0.000000e+00> : vector<2x8x8xf32>
    %36 = tpu.matmul %31, %33, %cst_12 {dimension_numbers = #tpu.dot_dimension_numbers<[2], [2], [1], [1], [0, 0, 0, 1, 1, 1], [0], [0]>, precision = #tpu.contract_precision<fp32>} : vector<2x8x8xf32>, vector<2x8x8xf32>, vector<2x8x8xf32> -> vector<2x8x8xf32>
    "tpu.trace_stop"() : () -> ()
    %cst_13 = arith.constant 0.353553385 : f32
    %37 = vector.broadcast %cst_13 : f32 to vector<2x8x8xf32>
    %38 = arith.mulf %36, %37 : vector<2x8x8xf32>
    %cst_14 = arith.constant -1.000000e+30 : f32
    %39 = vector.shape_cast %29 : vector<1x8x8xi1> to vector<1x8x8xi1>
    %40 = vector.broadcast %39 : vector<1x8x8xi1> to vector<2x8x8xi1>
    %41 = vector.broadcast %cst_14 : f32 to vector<2x8x8xf32>
    %42 = arith.select %40, %38, %41 : vector<2x8x8xi1>, vector<2x8x8xf32>
    %cst_15 = arith.constant dense<0xFF800000> : vector<2x8xf32>
    %43 = vector.multi_reduction <maximumf>, %42, %cst_15 [2] : vector<2x8x8xf32> to vector<2x8xf32>
    %44 = vector.shape_cast %43 : vector<2x8xf32> to vector<2x8x1xf32>
    %45 = vector.broadcast %44 : vector<2x8x1xf32> to vector<2x8x8xf32>
    %46 = arith.subf %42, %45 : vector<2x8x8xf32>
    %47 = math.exp %46 : vector<2x8x8xf32>
    %cst_16 = arith.constant dense<0.000000e+00> : vector<2x8xf32>
    %48 = vector.multi_reduction <add>, %47, %cst_16 [2] : vector<2x8x8xf32> to vector<2x8xf32>
    %49 = vector.shape_cast %48 : vector<2x8xf32> to vector<2x8x1xf32>
    %50 = vector.broadcast %49 : vector<2x8x1xf32> to vector<2x8x8xf32>
    %51 = arith.divf %47, %50 : vector<2x8x8xf32>
    "tpu.trace_start"() <{level = 10 : i32, message = "bqk,bkd->bqd"}> : () -> ()
    %cst_17 = arith.constant dense<0.000000e+00> : vector<2x8x8xf32>
    %52 = tpu.matmul %51, %35, %cst_17 {dimension_numbers = #tpu.dot_dimension_numbers<[2], [1], [1], [2], [0, 0, 0, 1, 1, 2], [0], [0]>, precision = #tpu.contract_precision<fp32>} : vector<2x8x8xf32>, vector<2x8x8xf32>, vector<2x8x8xf32> -> vector<2x8x8xf32>
    "tpu.trace_stop"() : () -> ()
    %53 = vector.shape_cast %52 : vector<2x8x8xf32> to vector<16x8xf32>
    %c0_18 = arith.constant 0 : index
    %c0_19 = arith.constant 0 : index
    %54 = vector.load %arg12[%c0_18, %c0_19] : memref<16x32xf32, #tpu.memory_space<vmem>>, vector<16x8xf32>
    tpu.vector_store %arg12[%c0_18, %c0_19], %53 {strides = array<i32>} : memref<16x32xf32, #tpu.memory_space<vmem>>, vector<16x8xf32>,
    %55 = vector.extract_strided_slice %26 {offsets = [0, 8], sizes = [16, 8], strides = [1, 1]} : vector<16x96xf32> to vector<16x8xf32>
    %56 = vector.shape_cast %55 : vector<16x8xf32> to vector<2x8x8xf32>
    %57 = vector.extract_strided_slice %26 {offsets = [0, 40], sizes = [16, 8], strides = [1, 1]} : vector<16x96xf32> to vector<16x8xf32>
    %58 = vector.shape_cast %57 : vector<16x8xf32> to vector<2x8x8xf32>
    %59 = vector.extract_strided_slice %26 {offsets = [0, 72], sizes = [16, 8], strides = [1, 1]} : vector<16x96xf32> to vector<16x8xf32>
    %60 = vector.shape_cast %59 : vector<16x8xf32> to vector<2x8x8xf32>
    "tpu.trace_start"() <{level = 10 : i32, message = "bqd,bkd->bqk"}> : () -> ()
    %cst_20 = arith.constant dense<0.000000e+00> : vector<2x8x8xf32>
    %61 = tpu.matmul %56, %58, %cst_20 {dimension_numbers = #tpu.dot_dimension_numbers<[2], [2], [1], [1], [0, 0, 0, 1, 1, 1], [0], [0]>, precision = #tpu.contract_precision<fp32>} : vector<2x8x8xf32>, vector<2x8x8xf32>, vector<2x8x8xf32> -> vector<2x8x8xf32>
    "tpu.trace_stop"() : () -> ()
    %cst_21 = arith.constant 0.353553385 : f32
    %62 = vector.broadcast %cst_21 : f32 to vector<2x8x8xf32>
    %63 = arith.mulf %61, %62 : vector<2x8x8xf32>
    %cst_22 = arith.constant -1.000000e+30 : f32
    %64 = vector.shape_cast %29 : vector<1x8x8xi1> to vector<1x8x8xi1>
    %65 = vector.broadcast %64 : vector<1x8x8xi1> to vector<2x8x8xi1>
    %66 = vector.broadcast %cst_22 : f32 to vector<2x8x8xf32>
    %67 = arith.select %65, %63, %66 : vector<2x8x8xi1>, vector<2x8x8xf32>
    %cst_23 = arith.constant dense<0xFF800000> : vector<2x8xf32>
    %68 = vector.multi_reduction <maximumf>, %67, %cst_23 [2] : vector<2x8x8xf32> to vector<2x8xf32>
    %69 = vector.shape_cast %68 : vector<2x8xf32> to vector<2x8x1xf32>
    %70 = vector.broadcast %69 : vector<2x8x1xf32> to vector<2x8x8xf32>
    %71 = arith.subf %67, %70 : vector<2x8x8xf32>
    %72 = math.exp %71 : vector<2x8x8xf32>
    %cst_24 = arith.constant dense<0.000000e+00> : vector<2x8xf32>
    %73 = vector.multi_reduction <add>, %72, %cst_24 [2] : vector<2x8x8xf32> to vector<2x8xf32>
    %74 = vector.shape_cast %73 : vector<2x8xf32> to vector<2x8x1xf32>
    %75 = vector.broadcast %74 : vector<2x8x1xf32> to vector<2x8x8xf32>
    %76 = arith.divf %72, %75 : vector<2x8x8xf32>
    "tpu.trace_start"() <{level = 10 : i32, message = "bqk,bkd->bqd"}> : () -> ()
    %cst_25 = arith.constant dense<0.000000e+00> : vector<2x8x8xf32>
    %77 = tpu.matmul %76, %60, %cst_25 {dimension_numbers = #tpu.dot_dimension_numbers<[2], [1], [1], [2], [0, 0, 0, 1, 1, 2], [0], [0]>, precision = #tpu.contract_precision<fp32>} : vector<2x8x8xf32>, vector<2x8x8xf32>, vector<2x8x8xf32> -> vector<2x8x8xf32>
    "tpu.trace_stop"() : () -> ()
    %78 = vector.shape_cast %77 : vector<2x8x8xf32> to vector<16x8xf32>
    %c0_26 = arith.constant 0 : index
    %c8 = arith.constant 8 : index
    %79 = vector.load %arg12[%c0_26, %c8] : memref<16x32xf32, #tpu.memory_space<vmem>>, vector<16x8xf32>
    tpu.vector_store %arg12[%c0_26, %c8], %78 {strides = array<i32>} : memref<16x32xf32, #tpu.memory_space<vmem>>, vector<16x8xf32>,
    %80 = vector.extract_strided_slice %26 {offsets = [0, 16], sizes = [16, 8], strides = [1, 1]} : vector<16x96xf32> to vector<16x8xf32>
    %81 = vector.shape_cast %80 : vector<16x8xf32> to vector<2x8x8xf32>
    %82 = vector.extract_strided_slice %26 {offsets = [0, 48], sizes = [16, 8], strides = [1, 1]} : vector<16x96xf32> to vector<16x8xf32>
    %83 = vector.shape_cast %82 : vector<16x8xf32> to vector<2x8x8xf32>
    %84 = vector.extract_strided_slice %26 {offsets = [0, 80], sizes = [16, 8], strides = [1, 1]} : vector<16x96xf32> to vector<16x8xf32>
    %85 = vector.shape_cast %84 : vector<16x8xf32> to vector<2x8x8xf32>
    "tpu.trace_start"() <{level = 10 : i32, message = "bqd,bkd->bqk"}> : () -> ()
    %cst_27 = arith.constant dense<0.000000e+00> : vector<2x8x8xf32>
    %86 = tpu.matmul %81, %83, %cst_27 {dimension_numbers = #tpu.dot_dimension_numbers<[2], [2], [1], [1], [0, 0, 0, 1, 1, 1], [0], [0]>, precision = #tpu.contract_precision<fp32>} : vector<2x8x8xf32>, vector<2x8x8xf32>, vector<2x8x8xf32> -> vector<2x8x8xf32>
    "tpu.trace_stop"() : () -> ()
    %cst_28 = arith.constant 0.353553385 : f32
    %87 = vector.broadcast %cst_28 : f32 to vector<2x8x8xf32>
    %88 = arith.mulf %86, %87 : vector<2x8x8xf32>
    %cst_29 = arith.constant -1.000000e+30 : f32
    %89 = vector.shape_cast %29 : vector<1x8x8xi1> to vector<1x8x8xi1>
    %90 = vector.broadcast %89 : vector<1x8x8xi1> to vector<2x8x8xi1>
    %91 = vector.broadcast %cst_29 : f32 to vector<2x8x8xf32>
    %92 = arith.select %90, %88, %91 : vector<2x8x8xi1>, vector<2x8x8xf32>
    %cst_30 = arith.constant dense<0xFF800000> : vector<2x8xf32>
    %93 = vector.multi_reduction <maximumf>, %92, %cst_30 [2] : vector<2x8x8xf32> to vector<2x8xf32>
    %94 = vector.shape_cast %93 : vector<2x8xf32> to vector<2x8x1xf32>
    %95 = vector.broadcast %94 : vector<2x8x1xf32> to vector<2x8x8xf32>
    %96 = arith.subf %92, %95 : vector<2x8x8xf32>
    %97 = math.exp %96 : vector<2x8x8xf32>
    %cst_31 = arith.constant dense<0.000000e+00> : vector<2x8xf32>
    %98 = vector.multi_reduction <add>, %97, %cst_31 [2] : vector<2x8x8xf32> to vector<2x8xf32>
    %99 = vector.shape_cast %98 : vector<2x8xf32> to vector<2x8x1xf32>
    %100 = vector.broadcast %99 : vector<2x8x1xf32> to vector<2x8x8xf32>
    %101 = arith.divf %97, %100 : vector<2x8x8xf32>
    "tpu.trace_start"() <{level = 10 : i32, message = "bqk,bkd->bqd"}> : () -> ()
    %cst_32 = arith.constant dense<0.000000e+00> : vector<2x8x8xf32>
    %102 = tpu.matmul %101, %85, %cst_32 {dimension_numbers = #tpu.dot_dimension_numbers<[2], [1], [1], [2], [0, 0, 0, 1, 1, 2], [0], [0]>, precision = #tpu.contract_precision<fp32>} : vector<2x8x8xf32>, vector<2x8x8xf32>, vector<2x8x8xf32> -> vector<2x8x8xf32>
    "tpu.trace_stop"() : () -> ()
    %103 = vector.shape_cast %102 : vector<2x8x8xf32> to vector<16x8xf32>
    %c0_33 = arith.constant 0 : index
    %c16 = arith.constant 16 : index
    %104 = vector.load %arg12[%c0_33, %c16] : memref<16x32xf32, #tpu.memory_space<vmem>>, vector<16x8xf32>
    tpu.vector_store %arg12[%c0_33, %c16], %103 {strides = array<i32>} : memref<16x32xf32, #tpu.memory_space<vmem>>, vector<16x8xf32>,
    %105 = vector.extract_strided_slice %26 {offsets = [0, 24], sizes = [16, 8], strides = [1, 1]} : vector<16x96xf32> to vector<16x8xf32>
    %106 = vector.shape_cast %105 : vector<16x8xf32> to vector<2x8x8xf32>
    %107 = vector.extract_strided_slice %26 {offsets = [0, 56], sizes = [16, 8], strides = [1, 1]} : vector<16x96xf32> to vector<16x8xf32>
    %108 = vector.shape_cast %107 : vector<16x8xf32> to vector<2x8x8xf32>
    %109 = vector.extract_strided_slice %26 {offsets = [0, 88], sizes = [16, 8], strides = [1, 1]} : vector<16x96xf32> to vector<16x8xf32>
    %110 = vector.shape_cast %109 : vector<16x8xf32> to vector<2x8x8xf32>
    "tpu.trace_start"() <{level = 10 : i32, message = "bqd,bkd->bqk"}> : () -> ()
    %cst_34 = arith.constant dense<0.000000e+00> : vector<2x8x8xf32>
    %111 = tpu.matmul %106, %108, %cst_34 {dimension_numbers = #tpu.dot_dimension_numbers<[2], [2], [1], [1], [0, 0, 0, 1, 1, 1], [0], [0]>, precision = #tpu.contract_precision<fp32>} : vector<2x8x8xf32>, vector<2x8x8xf32>, vector<2x8x8xf32> -> vector<2x8x8xf32>
    "tpu.trace_stop"() : () -> ()
    %cst_35 = arith.constant 0.353553385 : f32
    %112 = vector.broadcast %cst_35 : f32 to vector<2x8x8xf32>
    %113 = arith.mulf %111, %112 : vector<2x8x8xf32>
    %cst_36 = arith.constant -1.000000e+30 : f32
    %114 = vector.shape_cast %29 : vector<1x8x8xi1> to vector<1x8x8xi1>
    %115 = vector.broadcast %114 : vector<1x8x8xi1> to vector<2x8x8xi1>
    %116 = vector.broadcast %cst_36 : f32 to vector<2x8x8xf32>
    %117 = arith.select %115, %113, %116 : vector<2x8x8xi1>, vector<2x8x8xf32>
    %cst_37 = arith.constant dense<0xFF800000> : vector<2x8xf32>
    %118 = vector.multi_reduction <maximumf>, %117, %cst_37 [2] : vector<2x8x8xf32> to vector<2x8xf32>
    %119 = vector.shape_cast %118 : vector<2x8xf32> to vector<2x8x1xf32>
    %120 = vector.broadcast %119 : vector<2x8x1xf32> to vector<2x8x8xf32>
    %121 = arith.subf %117, %120 : vector<2x8x8xf32>
    %122 = math.exp %121 : vector<2x8x8xf32>
    %cst_38 = arith.constant dense<0.000000e+00> : vector<2x8xf32>
    %123 = vector.multi_reduction <add>, %122, %cst_38 [2] : vector<2x8x8xf32> to vector<2x8xf32>
    %124 = vector.shape_cast %123 : vector<2x8xf32> to vector<2x8x1xf32>
    %125 = vector.broadcast %124 : vector<2x8x1xf32> to vector<2x8x8xf32>
    %126 = arith.divf %122, %125 : vector<2x8x8xf32>
    "tpu.trace_start"() <{level = 10 : i32, message = "bqk,bkd->bqd"}> : () -> ()
    %cst_39 = arith.constant dense<0.000000e+00> : vector<2x8x8xf32>
    %127 = tpu.matmul %126, %110, %cst_39 {dimension_numbers = #tpu.dot_dimension_numbers<[2], [1], [1], [2], [0, 0, 0, 1, 1, 2], [0], [0]>, precision = #tpu.contract_precision<fp32>} : vector<2x8x8xf32>, vector<2x8x8xf32>, vector<2x8x8xf32> -> vector<2x8x8xf32>
    "tpu.trace_stop"() : () -> ()
    %128 = vector.shape_cast %127 : vector<2x8x8xf32> to vector<16x8xf32>
    %c0_40 = arith.constant 0 : index
    %c24 = arith.constant 24 : index
    %129 = vector.load %arg12[%c0_40, %c24] : memref<16x32xf32, #tpu.memory_space<vmem>>, vector<16x8xf32>
    tpu.vector_store %arg12[%c0_40, %c24], %128 {strides = array<i32>} : memref<16x32xf32, #tpu.memory_space<vmem>>, vector<16x8xf32>,
    %c0_41 = arith.constant 0 : index
    %c0_42 = arith.constant 0 : index
    %130 = vector.load %arg12[%c0_41, %c0_42] : memref<16x32xf32, #tpu.memory_space<vmem>>, vector<16x32xf32>
    %131 = arith.addf %0, %130 : vector<16x32xf32>
    %cst_43 = arith.constant dense<0.000000e+00> : vector<16xf32>
    %132 = vector.multi_reduction <add>, %131, %cst_43 [1] : vector<16x32xf32> to vector<16xf32>
    %133 = vector.shape_cast %132 : vector<16xf32> to vector<16x1xf32>
    %cst_44 = arith.constant 3.200000e+01 : f32
    %134 = vector.broadcast %cst_44 : f32 to vector<16x1xf32>
    %135 = arith.divf %133, %134 : vector<16x1xf32>
    %136 = vector.broadcast %135 : vector<16x1xf32> to vector<16x32xf32>
    %137 = arith.subf %131, %136 : vector<16x32xf32>
    %138 = arith.mulf %137, %137 : vector<16x32xf32>
    %cst_45 = arith.constant dense<0.000000e+00> : vector<16xf32>
    %139 = vector.multi_reduction <add>, %138, %cst_45 [1] : vector<16x32xf32> to vector<16xf32>
    %140 = vector.shape_cast %139 : vector<16xf32> to vector<16x1xf32>
    %cst_46 = arith.constant 3.200000e+01 : f32
    %141 = vector.broadcast %cst_46 : f32 to vector<16x1xf32>
    %142 = arith.divf %140, %141 : vector<16x1xf32>
    %143 = vector.broadcast %135 : vector<16x1xf32> to vector<16x32xf32>
    %144 = arith.subf %131, %143 : vector<16x32xf32>
    %cst_47 = arith.constant 9.99999974E-6 : f32
    %145 = vector.broadcast %cst_47 : f32 to vector<16x1xf32>
    %146 = arith.addf %142, %145 : vector<16x1xf32>
    %147 = math.rsqrt %146 : vector<16x1xf32>
    %148 = vector.broadcast %147 : vector<16x1xf32> to vector<16x32xf32>
    %149 = arith.mulf %144, %148 : vector<16x32xf32>
    %c0_48 = arith.constant 0 : index
    %c0_49 = arith.constant 0 : index
    %150 = vector.load %arg5[%c0_48, %c0_49] : memref<1x32xf32, #tpu.memory_space<vmem>>, vector<1x32xf32>
    %151 = vector.broadcast %150 : vector<1x32xf32> to vector<16x32xf32>
    %152 = arith.mulf %149, %151 : vector<16x32xf32>
    %c0_50 = arith.constant 0 : index
    %c0_51 = arith.constant 0 : index
    %153 = vector.load %arg6[%c0_50, %c0_51] : memref<1x32xf32, #tpu.memory_space<vmem>>, vector<1x32xf32>
    %154 = vector.broadcast %153 : vector<1x32xf32> to vector<16x32xf32>
    %155 = arith.addf %152, %154 : vector<16x32xf32>
    %c0_52 = arith.constant 0 : index
    %c0_53 = arith.constant 0 : index
    %156 = vector.load %arg7[%c0_52, %c0_53] : memref<32x128xf32, #tpu.memory_space<vmem>>, vector<32x128xf32>
    %cst_54 = arith.constant dense<0.000000e+00> : vector<16x128xf32>
    %157 = tpu.matmul %155, %156, %cst_54 {dimension_numbers = #tpu.dot_dimension_numbers<[1], [0], [0], [1], [0, 0, 1, 1], [], []>, precision = #tpu.contract_precision<fp32>} : vector<16x32xf32>, vector<32x128xf32>, vector<16x128xf32> -> vector<16x128xf32>
    %c0_55 = arith.constant 0 : index
    %c0_56 = arith.constant 0 : index
    %158 = vector.load %arg8[%c0_55, %c0_56] : memref<1x128xf32, #tpu.memory_space<vmem>>, vector<1x128xf32>
    %159 = vector.broadcast %158 : vector<1x128xf32> to vector<16x128xf32>
    %160 = arith.addf %157, %159 : vector<16x128xf32>
    %cst_57 = arith.constant 0.000000e+00 : f32
    %161 = vector.broadcast %cst_57 : f32 to vector<16x128xf32>
    %162 = arith.maximumf %160, %161 : vector<16x128xf32>
    %c0_58 = arith.constant 0 : index
    %c0_59 = arith.constant 0 : index
    %163 = vector.load %arg9[%c0_58, %c0_59] : memref<128x32xf32, #tpu.memory_space<vmem>>, vector<128x32xf32>
    %cst_60 = arith.constant dense<0.000000e+00> : vector<16x32xf32>
    %164 = tpu.matmul %162, %163, %cst_60 {dimension_numbers = #tpu.dot_dimension_numbers<[1], [0], [0], [1], [0, 0, 1, 1], [], []>, precision = #tpu.contract_precision<fp32>} : vector<16x128xf32>, vector<128x32xf32>, vector<16x32xf32> -> vector<16x32xf32>
    %c0_61 = arith.constant 0 : index
    %c0_62 = arith.constant 0 : index
    %165 = vector.load %arg10[%c0_61, %c0_62] : memref<1x32xf32, #tpu.memory_space<vmem>>, vector<1x32xf32>
    %166 = vector.broadcast %165 : vector<1x32xf32> to vector<16x32xf32>
    %167 = arith.addf %164, %166 : vector<16x32xf32>
    %168 = arith.addf %131, %167 : vector<16x32xf32>
    %cst_63 = arith.constant 1.000000e+04 : f32
    %169 = vector.broadcast %cst_63 : f32 to vector<16x32xf32>
    %170 = arith.mulf %168, %169 : vector<16x32xf32>
    %171 = math.roundeven %170 : vector<16x32xf32>
    %cst_64 = arith.constant 1.000000e+04 : f32
    %172 = vector.broadcast %cst_64 : f32 to vector<16x32xf32>
    %173 = arith.divf %171, %172 : vector<16x32xf32>
    %c0_65 = arith.constant 0 : index
    %c0_66 = arith.constant 0 : index
    %174 = vector.load %arg11[%c0_65, %c0_66] : memref<16x32xf32, #tpu.memory_space<vmem>>, vector<16x32xf32>
    tpu.vector_store %arg11[%c0_65, %c0_66], %173 {strides = array<i32>} : memref<16x32xf32, #tpu.memory_space<vmem>>, vector<16x32xf32>,
    return
  }
  func.func @transform_0(%arg0: i32) -> (i32, i32) {
    %c0_i32 = arith.constant 0 : i32
    %c0_i32_0 = arith.constant 0 : i32
    return %arg0, %c0_i32 : i32, i32
  }
  func.func @transform_1(%arg0: i32) -> (i32, i32) {
    %c0_i32 = arith.constant 0 : i32
    %c0_i32_0 = arith.constant 0 : i32
    %c0_i32_1 = arith.constant 0 : i32
    return %c0_i32, %c0_i32_0 : i32, i32
  }
  func.func @transform_2(%arg0: i32) -> (i32, i32) {
    %c0_i32 = arith.constant 0 : i32
    %c0_i32_0 = arith.constant 0 : i32
    %c0_i32_1 = arith.constant 0 : i32
    return %c0_i32, %c0_i32_0 : i32, i32
  }
  func.func @transform_3(%arg0: i32) -> (i32, i32) {
    %c0_i32 = arith.constant 0 : i32
    %c0_i32_0 = arith.constant 0 : i32
    %c0_i32_1 = arith.constant 0 : i32
    return %c0_i32, %c0_i32_0 : i32, i32
  }
  func.func @transform_4(%arg0: i32) -> (i32, i32) {
    %c0_i32 = arith.constant 0 : i32
    %c0_i32_0 = arith.constant 0 : i32
    %c0_i32_1 = arith.constant 0 : i32
    return %c0_i32, %c0_i32_0 : i32, i32
  }
  func.func @transform_5(%arg0: i32) -> (i32, i32) {
    %c0_i32 = arith.constant 0 : i32
    %c0_i32_0 = arith.constant 0 : i32
    %c0_i32_1 = arith.constant 0 : i32
    return %c0_i32, %c0_i32_0 : i32, i32
  }
  func.func @transform_6(%arg0: i32) -> (i32, i32) {
    %c0_i32 = arith.constant 0 : i32
    %c0_i32_0 = arith.constant 0 : i32
    %c0_i32_1 = arith.constant 0 : i32
    return %c0_i32, %c0_i32_0 : i32, i32
  }
  func.func @transform_7(%arg0: i32) -> (i32, i32) {
    %c0_i32 = arith.constant 0 : i32
    %c0_i32_0 = arith.constant 0 : i32
    %c0_i32_1 = arith.constant 0 : i32
    return %c0_i32, %c0_i32_0 : i32, i32
  }
  func.func @transform_8(%arg0: i32) -> (i32, i32) {
    %c0_i32 = arith.constant 0 : i32
    %c0_i32_0 = arith.constant 0 : i32
    %c0_i32_1 = arith.constant 0 : i32
    return %c0_i32, %c0_i32_0 : i32, i32
  }
  func.func @transform_9(%arg0: i32) -> (i32, i32) {
    %c0_i32 = arith.constant 0 : i32
    %c0_i32_0 = arith.constant 0 : i32
    %c0_i32_1 = arith.constant 0 : i32
    return %c0_i32, %c0_i32_0 : i32, i32
  }
  func.func @transform_10(%arg0: i32) -> (i32, i32) {
    %c0_i32 = arith.constant 0 : i32
    %c0_i32_0 = arith.constant 0 : i32
    return %arg0, %c0_i32 : i32, i32
  }
}

</mosaic_0001>

<bundles_post_ra>
// kernel: tpu_custom_call.1
= control target key start
LH: loop header
LB: loop body
LE: loop exit
PB: predicated region body
PF: predicated region fallthrough
CT: control target
= control target key end

     0   :  { %vm38_vm0 = vcmask 261120   ;;  %s12074_s0 = inlined_call_operand.vmem [shape: f32[16,32], index: 0, kind: input, shape index: {}]   ;;  %s12075_s1 = inlined_call_operand.vmem [shape: f32[32,96], index: 1, kind: input, shape index: {}]   ;;  %s12076_s2 = inlined_call_operand.vmem [shape: f32[1,32], index: 2, kind: input, shape index: {}]   ;;  %s12077_s3 = inlined_call_operand.vmem [shape: f32[1,32], index: 3, kind: input, shape index: {}]   ;;  %s12078_s4 = inlined_call_operand.vmem [shape: f32[1,32], index: 4, kind: input, shape index: {}]   ;;  %s12079_s5 = inlined_call_operand.vmem [shape: f32[1,32], index: 5, kind: input, shape index: {}]   ;;  %s12080_s6 = inlined_call_operand.vmem [shape: f32[32,128], index: 6, kind: input, shape index: {}]   ;;  %s12081_s7 = inlined_call_operand.vmem [shape: f32[1,128], index: 7, kind: input, shape index: {}]   ;;  %s12082_s8 = inlined_call_operand.vmem [shape: f32[128,32], index: 8, kind: input, shape index: {}]   ;;  %s12083_s9 = inlined_call_operand.vmem [shape: f32[1,32], index: 9, kind: input, shape index: {}]   ;;  %s12084_s10 = inlined_call_operand.hbm [shape: f32[16,32], index: 10, kind: output, shape index: {}]  }
   0x1   :  { %v36_v0 = vld [vmem:[%s12074_s0] sm:$0xff]  ;;  %v37_v1 = vld [vmem:[%s12074_s0 + $0x8] sm:$0xff] }
   0x2   :  { %15 = vsyncpa [#allocation4], 0  ;;  %v39_v2 = vsel %vm38_vm0, %v36_v0, 0.0  ;;  %v42_v3 = vsel %vm38_vm0, %v37_v1, 0.0  ;;  %v84_v14 = vld [vmem:[%s12075_s1] sm:$0xff]  ;;  %v85_v15 = vld [vmem:[%s12075_s1 + $0x8] sm:$0xff] }
   0x3   :  { %40 = vadd.xlane.f32.xlu0 %v39_v2  ;;  %v86_v16 = vld [vmem:[%s12075_s1 + $0x10] sm:$0xff]  ;;  %v95_v17 = vand.u32 4294901760, %v84_v14  ;;  %v98_v18 = vand.u32 4294901760, %v85_v15  ;;  %v87_v19 = vld [vmem:[%s12075_s1 + $0x18] sm:$0xff]  ;;  %v9344_v53 = vld [vmem:[%s12076_s2] ss:$0 sm:$0xff] }
   0x4   :  { %v101_v20 = vand.u32 4294901760, %v86_v16  ;;  %v104_v21 = vand.u32 4294901760, %v87_v19  ;;  %v9345_v55 = vld [vmem:[%s12077_s3] ss:$0 sm:$0xff]  ;;  %vm11112_vm1 = vmmov 0   ;;  %s11113_s2 = smov 96  }
   0x5   :  { %v11206_v22 = vpack.c.bf16 %v98_v18, %v95_v17  ;;  %v185_v24 = vsub.f32 %v84_v14, %v95_v17  ;;  %v192_v25 = vsub.f32 %v85_v15, %v98_v18  ;;  %vm630_vm2 = vcmask 64512   ;;  %s11114_s3 = smov 64   ;;  %s11115_s28 = smov 88  }
   0x6   :  { %v11208_v23 = vpack.c.bf16 %v104_v21, %v101_v20  ;;  %v199_v30 = vsub.f32 %v86_v16, %v101_v20  ;;  %v206_v31 = vsub.f32 %v87_v19, %v104_v21  ;;  %s11116_s29 = smov 120   ;;  %s11117_s30 = smov 56   ;;  %vm4314_vm4 = vcmask 130112  }
   0x7   :  { %43 = vadd.xlane.f32.xlu0 %v42_v3  ;;  %10545 = vmatprep.subr.bf16.mxu0 %v11206_v22  ;;  %v186_v26 = vand.u32 4294901760, %v185_v24  ;;  %v193_v27 = vand.u32 4294901760, %v192_v25  ;;  %v10560_v42 = vpack.c.bf16 %v192_v25, %v185_v24  ;;  %s11118_s11 = smov 112   ;;  %s11119_s12 = smov 80   ;;  %vm6163_vm5 = vcmask 195712  }
   0x8   :  { %10547 = vmatpush3.bf16.msra.mxu0 %v11206_v22  ;;  %v200_v34 = vand.u32 4294901760, %v199_v30  ;;  %v207_v35 = vand.u32 4294901760, %v206_v31  ;;  %v10564_v43 = vpack.c.bf16 %v206_v31, %v199_v30  ;;  %s11120_s13 = smov 48   ;;  %s11121_s14 = smov 104   ;;  %vm8012_vm6 = vcmask 261312  }
   0x9   :  { %10549 = vmatprep.subr.bf16.mxu0 %v11208_v23  ;;  %v187_v28 = vsub.f32 %v185_v24, %v186_v26  ;;  %v194_v29 = vsub.f32 %v192_v25, %v193_v27  ;;  %v10576_v44 = vpack.c.bf16 %v193_v27, %v186_v26  ;;  %s11122_s15 = smov 72   ;;  %s11123_s16 = smov 40  }
   0xa   :  { %v201_v37 = vsub.f32 %v199_v30, %v200_v34  ;;  %v208_v38 = vsub.f32 %v206_v31, %v207_v35  ;;  %v10580_v45 = vpack.c.bf16 %v207_v35, %v200_v34  ;;  %s11124_s17 = smov 8   ;;  %s11125_s18 = smov 16  }
   0xb   :  { %v188_v32 = vand.u32 4294901760, %v187_v28  ;;  %v195_v33 = vand.u32 4294901760, %v194_v29  ;;  %s11126_s19 = smov 24   ;;  %s11127_s20 = smov [#allocation3]  }
   0xc   :  { %10551 = vmatpush3.bf16.msra.mxu0 %v11208_v23  ;;  %v202_v39 = vand.u32 4294901760, %v201_v37  ;;  %v209_v40 = vand.u32 4294901760, %v208_v38  ;;  %s9333_s21 = sshll.u32 %s11127_s20, 4  ;;  %s9334_s21 = int_to_ptr.vmem [resolvable:$true] %s9333_s21 }
   0xd   :  { %v10552_v36 = vpack.c.bf16 %v195_v33, %v188_v32  ;;  %p11092_p1 = scmp.lt.s32.totalorder %s9334_s21, %s9334_s21 }
   0xe   :  { %v10556_v41 = vpack.c.bf16 %v209_v40, %v202_v39 }
   0xf   :  { %10553 = vmatprep.subr.bf16.mxu0 %v10552_v36 }
  0x90   :  { %v41_v4 = vpop.xlane.xlu0 %40 }
  0x91   :  { %v46_v5 = vmul.f32 0.03125, %v41_v4 }
  0x93   :  { %v48_v6 = vsub.f32 %v36_v0, %v46_v5 }
  0x94   :  { %v44_v7 = vpop.xlane.xlu0 %43 }
  0x95   :  { %v47_v8 = vmul.f32 0.03125, %v44_v7  ;;  %v50_v9 = vmul.f32 %v48_v6, %v48_v6 }
  0x97   :  { %v49_v10 = vsub.f32 %v37_v1, %v47_v8  ;;  %v52_v11 = vsel %vm38_vm0, %v50_v9, 0.0 }
  0x98   :  { %53 = vadd.xlane.f32.xlu1 %v52_v11 }
  0x99   :  { %v51_v12 = vmul.f32 %v49_v10, %v49_v10 }
  0x9b   :  { %v55_v13 = vsel %vm38_vm0, %v51_v12, 0.0 }
  0x9c   :  { %56 = vadd.xlane.f32.xlu1 %v55_v13 }
 0x125   :  { %v54_v46 = vpop.xlane.xlu1 %53 }
 0x126   :  { %v58_v47 = vmul.f32 0.03125, %v54_v46 }
 0x128   :  { %v60_v48 = vadd.f32 1e-05, %v58_v47 }
 0x129   :  { %v57_v49 = vpop.xlane.xlu1 %56 }
 0x12a   :  { %11045 = vrsqrt.f32 %v60_v48  ;;  %v59_v50 = vmul.f32 0.03125, %v57_v49 }
 0x12c   :  { %v61_v51 = vadd.f32 1e-05, %v59_v50 }
 0x12e   :  { %11047 = vrsqrt.f32 %v61_v51 }
 0x134   :  { %v11046_v52 = vpop.eup %11045 }
 0x135   :  { %v64_v54 = vmul.f32 %v11046_v52, %v48_v6 }
 0x137   :  { %v73_v56 = vmul.f32 %v9344_v53, %v64_v54 }
 0x138   :  { %v11048_v57 = vpop.eup %11047 }
 0x139   :  { %v65_v58 = vmul.f32 %v11048_v57, %v49_v10  ;;  %v82_v59 = vadd.f32 %v9345_v55, %v73_v56  ;;  %v11111_v10 = vmov 0.0  }
 0x13a   :  { %9798 = vmatprep.subr.mxu1 %v11111_v10  ;;  %9800 = vmatprep.mubr.msk.f32.mxu1 %vm11112_vm1, %v11111_v10 }
 0x13b   :  { %v74_v60 = vmul.f32 %v9344_v53, %v65_v58  ;;  %v89_v61 = vsel %vm38_vm0, %v82_v59, 0 }
 0x13c   :  { %v163_v62 = vand.u32 4294901760, %v89_v61 }
 0x13d   :  { %v83_v63 = vadd.f32 %v9345_v55, %v74_v60 }
 0x13e   :  { %v164_v0 = vsub.f32 %v89_v61, %v163_v62 }
 0x13f   :  { %v92_v1 = vsel %vm38_vm0, %v83_v63, 0 }
 0x140   :  { %v165_v2 = vand.u32 4294901760, %v164_v0  ;;  %v173_v3 = vand.u32 4294901760, %v92_v1 }
 0x142   :  { %v166_v4 = vsub.f32 %v164_v0, %v165_v2  ;;  %v174_v5 = vsub.f32 %v92_v1, %v173_v3 }
 0x144   :  { %v167_v6 = vand.u32 4294901760, %v166_v4  ;;  %v175_v7 = vand.u32 4294901760, %v174_v5 }
 0x146   :  { %9730 = vmatprep.mubr.f32.mxu0 %v167_v6  ;;  %v176_v8 = vsub.f32 %v174_v5, %v175_v7 }
 0x148   :  { %v177_v9 = vand.u32 4294901760, %v176_v8 }
 0x14a   :  { %9731 = vmatmul.mubr.f32.vlgmr.msra.gmra.mrb[0].mxu0 %v177_v9 }
 0x14b   :  { %10555 = vmatpush3.bf16.msra.mxu0 %v10552_v36  ;;  %9741 = vmatprep.mubr.f32.mxu0 %v163_v62 }
 0x14c   :  { %10557 = vmatprep.subr.bf16.mxu0 %v10556_v41 }
 0x14f   :  { %10559 = vmatpush3.bf16.msra.mxu0 %v10556_v41  ;;  %v622_v41 = vlaneseq }
 0x150   :  { %10561 = vmatprep.subr.bf16.mxu0 %v10560_v42 }
 0x152   :  { %9742 = vmatmul.mubr.f32.vlgmr.msra.gmra.mrb[0].mxu0 %v173_v3 }
 0x153   :  { %10563 = vmatpush3.bf16.msra.mxu0 %v10560_v42  ;;  %9752 = vmatprep.mubr.f32.mxu0 %v164_v0  ;;  %v623_v42 = vshrl.u32 %v622_v41, 7 }
 0x154   :  { %10565 = vmatprep.subr.bf16.mxu0 %v10564_v43 }
 0x157   :  { %10567 = vmatpush3.bf16.msra.mxu0 %v10564_v43  ;;  %v625_v43 = vand.u32 127, %v622_v41 }
 0x158   :  { %10569 = vmatprep.subr.bf16.mxu0 %v11206_v22 }
 0x159   :  { %vm11284_vm3 = vcmp.ge.s32.totalorder %v623_v42, %v625_v43 }
 0x15a   :  { %9753 = vmatmul.mubr.f32.vlgmr.msra.gmra.mrb[0].mxu0 %v174_v5 }
 0x15b   :  { %10571 = vmatpush3.bf16.msra.mxu0 %v11206_v22  ;;  %9763 = vmatprep.mubr.f32.mxu0 %v165_v2 }
 0x15c   :  { %10573 = vmatprep.subr.bf16.mxu0 %v11208_v23 }
 0x15f   :  { %10575 = vmatpush3.bf16.msra.mxu0 %v11208_v23 }
 0x160   :  { %10577 = vmatprep.subr.bf16.mxu0 %v10576_v44 }
 0x162   :  { %9764 = vmatmul.mubr.f32.vlgmr.msra.gmra.mrb[0].mxu0 %v175_v7 }
 0x163   :  { %10579 = vmatpush3.bf16.msra.mxu0 %v10576_v44  ;;  %9774 = vmatprep.mubr.f32.mxu0 %v163_v62 }
 0x164   :  { %10581 = vmatprep.subr.bf16.mxu0 %v10580_v45 }
 0x167   :  { %10583 = vmatpush3.bf16.msra.mxu0 %v10580_v45 }
 0x168   :  { %10585 = vmatprep.subr.bf16.mxu0 %v11206_v22 }
 0x16a   :  { %9775 = vmatmul.mubr.f32.vlgmr.msra.gmra.mrb[0].mxu0 %v173_v3 }
 0x16b   :  { %10587 = vmatpush3.bf16.msra.mxu0 %v11206_v22  ;;  %9785 = vmatprep.mubr.f32.mxu0 %v163_v62 }
 0x16c   :  { %10589 = vmatprep.subr.bf16.mxu0 %v11208_v23 }
 0x16f   :  { %10591 = vmatpush3.bf16.msra.mxu0 %v11208_v23 }
 0x170   :  { %9788 = vmatprep.subr.mxu0 %v11111_v10 }
 0x172   :  { %9786 = vmatmul.mubr.f32.vlgmr.msra.gmra.mrb[0].mxu0 %v173_v3 }
 0x173   :  { %9790 = vmatprep.mubr.msk.f32.mxu0 %vm11112_vm1, %v11111_v10 }
 0x245   :  { %v11236_v11 = vpop.f32.mrb[0].mxu0 }
 0x246   :  { %1082 = vrot.lane.b32.xlu1 %v11236_v11, %s11113_s2  ;;  %v11239_v12 = vpop.f32.mrb[1].mxu0  ;;  %v1084_v27 = vsel %vm630_vm2, %v11236_v11, 0 }
 0x247   :  { %628 = vrot.lane.b32.xlu0 %v11239_v12, %s11113_s2  ;;  %v631_v13 = vsel %vm630_vm2, %v11239_v12, 0  ;;  %v1154_v29 = vand.u32 4294901760, %v1084_v27 }
 0x248   :  { %v701_v14 = vand.u32 4294901760, %v631_v13 }
 0x249   :  { %v1155_v31 = vsub.f32 %v1084_v27, %v1154_v29 }
 0x24a   :  { %v702_v15 = vsub.f32 %v631_v13, %v701_v14 }
 0x24b   :  { %v1156_v33 = vand.u32 4294901760, %v1155_v31 }
 0x24c   :  { %v703_v16 = vand.u32 4294901760, %v702_v15 }
 0x24d   :  { %v1157_v35 = vsub.f32 %v1155_v31, %v1156_v33 }
 0x24e   :  { %v704_v19 = vsub.f32 %v702_v15, %v703_v16 }
 0x24f   :  { %v1158_v37 = vand.u32 4294901760, %v1157_v35 }
 0x250   :  { %v705_v22 = vand.u32 4294901760, %v704_v19 }
 0x2b8   :  { %v1083_v26 = vpop.permute.xlu1 %1082 }
 0x2b9   :  { %v629_v17 = vpop.permute.xlu0 %628  ;;  %v1086_v28 = vsel %vm630_vm2, %v1083_v26, 0 }
 0x2ba   :  { %v633_v18 = vsel %vm630_vm2, %v629_v17, 0  ;;  %v1089_v30 = vand.u32 4294901760, %v1086_v28 }
 0x2bb   :  { %v636_v20 = vand.u32 4294901760, %v633_v18 }
 0x2bc   :  { %v1166_v32 = vsub.f32 %v1086_v28, %v1089_v30 }
 0x2bd   :  { %v713_v21 = vsub.f32 %v633_v18, %v636_v20  ;;  %9789 = vmatpush3.xpose.msra.mxu0 %v636_v20 }
 0x2be   :  { %9793 = vmatprep.subr.mxu0 %v11111_v10  ;;  %v1167_v34 = vand.u32 4294901760, %v1166_v32 }
 0x2bf   :  { %v714_v23 = vand.u32 4294901760, %v713_v21  ;;  %9799 = vmatpush3.xpose.msra.mxu1 %v713_v21 }
 0x2c0   :  { %9791 = vmatmul.mubr.f32.vlgmr.msra.gmra.mrb[2].mxu0 %v705_v22  ;;  %9803 = vmatprep.subr.mxu1 %v11111_v10  ;;  %v1168_v36 = vsub.f32 %v1166_v32, %v1167_v34 }
 0x2c1   :  { %v715_v24 = vsub.f32 %v713_v21, %v714_v23  ;;  %9795 = vmatprep.mubr.msk.f32.mxu0 %vm11112_vm1, %v11111_v10 }
 0x2c2   :  { %9801 = vmatmul.mubr.f32.vlgmr.msra.gmra.mrb[0].mxu1 %v702_v15  ;;  %v1169_v38 = vand.u32 4294901760, %v1168_v36 }
 0x2c3   :  { %v716_v25 = vand.u32 4294901760, %v715_v24  ;;  %9804 = vmatpush3.xpose.msra.mxu1 %v636_v20  ;;  %9805 = vmatprep.mubr.msk.f32.mxu1 %vm11112_vm1, %v11111_v10 }
 0x2c4   :  { %9808 = vmatprep.subr.mxu1 %v11111_v10 }
 0x2c5   :  { %9794 = vmatpush3.xpose.msra.mxu0 %v716_v25 }
 0x2c6   :  { %9848 = vmatprep.subr.mxu0 %v11111_v10 }
 0x2c8   :  { %9796 = vmatmul.mubr.f32.vlgmr.msra.gmra.mrb[2].mxu0 %v701_v14 }
 0x2c9   :  { %9850 = vmatprep.mubr.msk.f32.mxu0 %vm11112_vm1, %v11111_v10 }
 0x2ca   :  { %9806 = vmatmul.mubr.f32.vlgmr.msra.gmra.mrb[0].mxu1 %v703_v16 }
 0x2cb   :  { %9809 = vmatpush3.xpose.msra.mxu1 %v714_v23  ;;  %9810 = vmatprep.mubr.msk.f32.mxu1 %vm11112_vm1, %v11111_v10 }
 0x2cc   :  { %9813 = vmatprep.subr.mxu1 %v11111_v10 }
 0x2d2   :  { %9811 = vmatmul.mubr.f32.vlgmr.msra.gmra.mrb[0].mxu1 %v701_v14 }
 0x2d3   :  { %9814 = vmatpush3.xpose.msra.mxu1 %v636_v20  ;;  %9815 = vmatprep.mubr.msk.f32.mxu1 %vm11112_vm1, %v11111_v10 }
 0x2d4   :  { %9818 = vmatprep.subr.mxu1 %v11111_v10 }
 0x2da   :  { %9816 = vmatmul.mubr.f32.vlgmr.msra.gmra.mrb[0].mxu1 %v701_v14 }
 0x2db   :  { %9819 = vmatpush3.xpose.msra.mxu1 %v1089_v30  ;;  %9820 = vmatprep.mubr.msk.f32.mxu1 %vm11112_vm1, %v11111_v10 }
 0x2dc   :  { %9823 = vmatprep.subr.mxu1 %v11111_v10 }
 0x2de   :  { %9821 = vmatmul.mubr.f32.vlgmr.msra.gmra.mrb[2].mxu1 %v1158_v37 }
 0x2df   :  { %9824 = vmatpush3.xpose.msra.mxu1 %v1169_v38  ;;  %9825 = vmatprep.mubr.msk.f32.mxu1 %vm11112_vm1, %v11111_v10 }
 0x2e0   :  { %9828 = vmatprep.subr.mxu1 %v11111_v10 }
 0x2e6   :  { %9826 = vmatmul.mubr.f32.vlgmr.msra.gmra.mrb[2].mxu1 %v1154_v29 }
 0x2e7   :  { %9829 = vmatpush3.xpose.msra.mxu1 %v1166_v32  ;;  %9830 = vmatprep.mubr.msk.f32.mxu1 %vm11112_vm1, %v11111_v10 }
 0x2e8   :  { %9833 = vmatprep.subr.mxu1 %v11111_v10 }
 0x2ee   :  { %9831 = vmatmul.mubr.f32.vlgmr.msra.gmra.mrb[2].mxu1 %v1155_v31 }
 0x2ef   :  { %9834 = vmatpush3.xpose.msra.mxu1 %v1089_v30  ;;  %9835 = vmatprep.mubr.msk.f32.mxu1 %vm11112_vm1, %v11111_v10 }
 0x2f0   :  { %9838 = vmatprep.subr.mxu1 %v11111_v10 }
 0x2f6   :  { %9836 = vmatmul.mubr.f32.vlgmr.msra.gmra.mrb[2].mxu1 %v1156_v33 }
 0x2f7   :  { %9839 = vmatpush3.xpose.msra.mxu1 %v1167_v34  ;;  %9840 = vmatprep.mubr.msk.f32.mxu1 %vm11112_vm1, %v11111_v10 }
 0x2f8   :  { %9843 = vmatprep.subr.mxu1 %v11111_v10 }
 0x2fe   :  { %9841 = vmatmul.mubr.f32.vlgmr.msra.gmra.mrb[2].mxu1 %v1154_v29 }
 0x2ff   :  { %9844 = vmatpush3.xpose.msra.mxu1 %v1089_v30  ;;  %9845 = vmatprep.mubr.msk.f32.mxu1 %vm11112_vm1, %v11111_v10 }
 0x300   :  { %9878 = vmatprep.subr.mxu1 %v11111_v10 }
 0x306   :  { %9846 = vmatmul.mubr.f32.vlgmr.msra.gmra.mrb[2].mxu1 %v1154_v29 }
 0x307   :  { %9880 = vmatprep.mubr.msk.f32.mxu1 %vm11112_vm1, %v11111_v10 }
 0x39b   :  { %v783_v39 = vpop.f32.mrb[2].mxu0 }
 0x39c   :  { %v9797_v40 = vpop.f32.mrb[3].mxu0 }
 0x3ad   :  { %v1077_v44 = vpop.f32.mrb[0].mxu1 }
 0x3ae   :  { %v10832_v45 = vadd.f32 %v1077_v44, %v783_v39  ;;  %v9817_v46 = vpop.f32.mrb[1].mxu1 }
 0x3b0   :  { %v1534_v48 = vmul.f32 0.35355338, %v10832_v45 }
 0x3b2   :  { %v1538_v49 = vsel %vm11284_vm3, %v1534_v48, -1e+30 }
 0x3b3   :  { %v1540_v50 = vsel %vm630_vm2, %v1538_v49, -inf }
 0x3b4   :  { %1541 = vmax.xlane.f32.xlu1 %v1540_v50 }
 0x3d9   :  { %v1530_v51 = vpop.f32.mrb[2].mxu1 }
 0x3da   :  { %v1535_v52 = vmul.f32 0.35355338, %v1530_v51  ;;  %v9847_v53 = vpop.f32.mrb[3].mxu1 }
 0x3dc   :  { %v1539_v54 = vsel %vm11284_vm3, %v1535_v52, -1e+30 }
 0x3dd   :  { %v1543_v55 = vsel %vm630_vm2, %v1539_v54, -inf }
 0x3de   :  { %1544 = vmax.xlane.f32.xlu0 %v1543_v55 }
 0x441   :  { %v1542_v56 = vpop.xlane.xlu1 %1541 }
 0x442   :  { %v1546_v57 = vsub.f32 %v1538_v49, %v1542_v56 }
 0x444   :  { %v1548_v58 = vmul.f32 1.442695, %v1546_v57 }
 0x446   :  { %11049 = vpow2.f32 %v1548_v58 }
 0x450   :  { %v11050_v59 = vpop.eup %11049 }
 0x451   :  { %v1552_v60 = vsel %vm630_vm2, %v11050_v59, 0.0 }
 0x452   :  { %1553 = vadd.xlane.f32.xlu0 %v1552_v60 }
 0x468   :  { %1562 = vrot.lane.b32.xlu0 %v11239_v12, %s11114_s3 }
 0x46b   :  { %v1545_v61 = vpop.xlane.xlu0 %1544 }
 0x46c   :  { %v1547_v62 = vsub.f32 %v1539_v54, %v1545_v61  ;;  %2470 = vrot.lane.b32.xlu0 %v11239_v12, %s11115_s28 }
 0x46e   :  { %v1550_v63 = vmul.f32 1.442695, %v1547_v62 }
 0x470   :  { %11051 = vpow2.f32 %v1550_v63 }
 0x47a   :  { %v11052_v0 = vpop.eup %11051 }
 0x47b   :  { %v1555_v1 = vsel %vm630_vm2, %v11052_v0, 0.0 }
 0x47c   :  { %1556 = vadd.xlane.f32.xlu1 %v1555_v1 }
 0x48d   :  { %2014 = vrot.lane.b32.xlu1 %v11236_v11, %s11114_s3 }
 0x491   :  { %2468 = vrot.lane.b32.xlu1 %v11239_v12, %s11116_s29 }
 0x495   :  { %2922 = vrot.lane.b32.xlu1 %v11236_v11, %s11116_s29 }
 0x499   :  { %2924 = vrot.lane.b32.xlu1 %v11236_v11, %s11115_s28 }
 0x4df   :  { %v1554_v2 = vpop.xlane.xlu0 %1553 }
 0x4e0   :  { %11053 = vrcp.f32 %v1554_v2 }
 0x4e3   :  { %v1563_v3 = vpop.permute.xlu0 %1562 }
 0x4e4   :  { %v1569_v4 = vand.u32 4294901760, %v1563_v3 }
 0x4e6   :  { %9849 = vmatpush3.msra.mxu0 %v1569_v4  ;;  %v1646_v7 = vsub.f32 %v1563_v3, %v1569_v4 }
 0x4e7   :  { %9853 = vmatprep.subr.mxu0 %v11111_v10  ;;  %v2471_v21 = vpop.permute.xlu0 %2470 }
 0x4e8   :  { %v1647_v13 = vand.u32 4294901760, %v1646_v7  ;;  %v2474_v24 = vsel %vm630_vm2, %v2471_v21, 0 }
 0x4e9   :  { %v11322_v27 = vand.u32 4294901760, %v2474_v24 }
 0x4ea   :  { %v11054_v5 = vpop.eup %11053  ;;  %v1648_v16 = vsub.f32 %v1646_v7, %v1647_v13 }
 0x4eb   :  { %v1559_v6 = vmul.f32 %v11054_v5, %v11050_v59  ;;  %v2554_v33 = vsub.f32 %v2474_v24, %v11322_v27 }
 0x4ec   :  { %v1649_v19 = vand.u32 4294901760, %v1648_v16 }
 0x4ed   :  { %v1566_v8 = vsel %vm630_vm2, %v1559_v6, 0  ;;  %v2555_v39 = vand.u32 4294901760, %v2554_v33 }
 0x4ee   :  { %v1634_v9 = vand.u32 4294901760, %v1566_v8 }
 0x4ef   :  { %v2556_v44 = vsub.f32 %v2554_v33, %v2555_v39 }
 0x4f0   :  { %v1635_v14 = vsub.f32 %v1566_v8, %v1634_v9 }
 0x4f1   :  { %v2557_v49 = vand.u32 4294901760, %v2556_v44 }
 0x4f2   :  { %v1636_v15 = vand.u32 4294901760, %v1635_v14 }
 0x4f4   :  { %v1637_v17 = vsub.f32 %v1635_v14, %v1636_v15 }
 0x4f6   :  { %v1638_v18 = vand.u32 4294901760, %v1637_v17 }
 0x4f8   :  { %9851 = vmatmul.mubr.f32.vlgmr.msra.gmra.mrb[4].mxu0 %v1638_v18 }
 0x4f9   :  { %9854 = vmatpush3.msra.mxu0 %v1649_v19  ;;  %9855 = vmatprep.mubr.msk.f32.mxu0 %vm11112_vm1, %v11111_v10 }
 0x4fa   :  { %9858 = vmatprep.subr.mxu0 %v11111_v10 }
 0x500   :  { %9856 = vmatmul.mubr.f32.vlgmr.msra.gmra.mrb[4].mxu0 %v1634_v9 }
 0x501   :  { %9859 = vmatpush3.msra.mxu0 %v1646_v7  ;;  %9860 = vmatprep.mubr.msk.f32.mxu0 %vm11112_vm1, %v11111_v10 }
 0x502   :  { %9863 = vmatprep.subr.mxu0 %v11111_v10 }
 0x508   :  { %9861 = vmatmul.mubr.f32.vlgmr.msra.gmra.mrb[4].mxu0 %v1635_v14 }
 0x509   :  { %9864 = vmatpush3.msra.mxu0 %v1569_v4  ;;  %v1557_v20 = vpop.xlane.xlu1 %1556  ;;  %9865 = vmatprep.mubr.msk.f32.mxu0 %vm11112_vm1, %v11111_v10 }
 0x50a   :  { %11055 = vrcp.f32 %v1557_v20  ;;  %9868 = vmatprep.subr.mxu0 %v11111_v10 }
 0x50d   :  { %v2015_v22 = vpop.permute.xlu1 %2014 }
 0x50e   :  { %v11313_v23 = vand.u32 4294901760, %v2015_v22 }
 0x510   :  { %9866 = vmatmul.mubr.f32.vlgmr.msra.gmra.mrb[4].mxu0 %v1636_v15  ;;  %9879 = vmatpush3.msra.mxu1 %v11313_v23  ;;  %v2098_v31 = vsub.f32 %v2015_v22, %v11313_v23 }
 0x511   :  { %9869 = vmatpush3.msra.mxu0 %v1647_v13  ;;  %v2469_v25 = vpop.permute.xlu1 %2468  ;;  %9870 = vmatprep.mubr.msk.f32.mxu0 %vm11112_vm1, %v11111_v10 }
 0x512   :  { %v2472_v26 = vsel %vm630_vm2, %v2469_v25, 0  ;;  %9873 = vmatprep.subr.mxu0 %v11111_v10  ;;  %9883 = vmatprep.subr.mxu1 %v11111_v10  ;;  %v2099_v36 = vand.u32 4294901760, %v2098_v31 }
 0x513   :  { %v11324_v28 = vand.u32 4294901760, %v2472_v26 }
 0x514   :  { %v11056_v29 = vpop.eup %11055  ;;  %v2100_v41 = vsub.f32 %v2098_v31, %v2099_v36 }
 0x515   :  { %v1561_v30 = vmul.f32 %v11056_v29, %v11052_v0  ;;  %v2543_v32 = vsub.f32 %v2472_v26, %v11324_v28  ;;  %v2923_v50 = vpop.permute.xlu1 %2922 }
 0x516   :  { %v2101_v46 = vand.u32 4294901760, %v2100_v41  ;;  %v2926_v52 = vsel %vm630_vm2, %v2923_v50, 0 }
 0x517   :  { %v2018_v34 = vsel %vm630_vm2, %v1561_v30, 0  ;;  %v2544_v37 = vand.u32 4294901760, %v2543_v32  ;;  %v2996_v54 = vand.u32 4294901760, %v2926_v52 }
 0x518   :  { %9871 = vmatmul.mubr.f32.vlgmr.msra.gmra.mrb[4].mxu0 %v1634_v9  ;;  %v11330_v35 = vand.u32 4294901760, %v2018_v34 }
 0x519   :  { %9874 = vmatpush3.msra.mxu0 %v1569_v4  ;;  %9875 = vmatprep.mubr.msk.f32.mxu0 %vm11112_vm1, %v11111_v10  ;;  %v2545_v42 = vsub.f32 %v2543_v32, %v2544_v37  ;;  %v2925_v51 = vpop.permute.xlu1 %2924  ;;  %v2997_v56 = vsub.f32 %v2926_v52, %v2996_v54 }
 0x51a   :  { %9908 = vmatprep.subr.mxu0 %v11111_v10  ;;  %v2087_v38 = vsub.f32 %v2018_v34, %v11330_v35  ;;  %v2928_v53 = vsel %vm630_vm2, %v2925_v51, 0 }
 0x51b   :  { %v2546_v48 = vand.u32 4294901760, %v2545_v42  ;;  %v2931_v55 = vand.u32 4294901760, %v2928_v53  ;;  %v2998_v58 = vand.u32 4294901760, %v2997_v56 }
 0x51c   :  { %v2088_v40 = vand.u32 4294901760, %v2087_v38 }
 0x51d   :  { %v3008_v57 = vsub.f32 %v2928_v53, %v2931_v55  ;;  %v2999_v60 = vsub.f32 %v2997_v56, %v2998_v58 }
 0x51e   :  { %v2089_v43 = vsub.f32 %v2087_v38, %v2088_v40 }
 0x51f   :  { %v3009_v59 = vand.u32 4294901760, %v3008_v57  ;;  %v3000_v62 = vand.u32 4294901760, %v2999_v60 }
 0x520   :  { %9876 = vmatmul.mubr.f32.vlgmr.msra.gmra.mrb[4].mxu0 %v1634_v9  ;;  %v2090_v45 = vand.u32 4294901760, %v2089_v43 }
 0x521   :  { %9909 = vmatpush3.xpose.msra.mxu0 %v11322_v27  ;;  %9910 = vmatprep.mubr.msk.f32.mxu0 %vm11112_vm1, %v11111_v10  ;;  %v3010_v61 = vsub.f32 %v3008_v57, %v3009_v59 }
 0x522   :  { %9881 = vmatmul.mubr.f32.vlgmr.msra.gmra.mrb[4].mxu1 %v2090_v45  ;;  %9913 = vmatprep.subr.mxu0 %v11111_v10 }
 0x523   :  { %9884 = vmatpush3.msra.mxu1 %v2101_v46  ;;  %9885 = vmatprep.mubr.msk.f32.mxu1 %vm11112_vm1, %v11111_v10  ;;  %v3011_v63 = vand.u32 4294901760, %v3010_v61 }
 0x524   :  { %9911 = vmatmul.mubr.f32.vlgmr.msra.gmra.mrb[6].mxu0 %v2546_v48  ;;  %9888 = vmatprep.subr.mxu1 %v11111_v10 }
 0x525   :  { %9914 = vmatpush3.xpose.msra.mxu0 %v2557_v49  ;;  %9915 = vmatprep.mubr.msk.f32.mxu0 %vm11112_vm1, %v11111_v10 }
 0x526   :  { %9918 = vmatprep.subr.mxu0 %v11111_v10 }
 0x52a   :  { %9886 = vmatmul.mubr.f32.vlgmr.msra.gmra.mrb[4].mxu1 %v11330_v35 }
 0x52b   :  { %9889 = vmatpush3.msra.mxu1 %v2098_v31  ;;  %9890 = vmatprep.mubr.msk.f32.mxu1 %vm11112_vm1, %v11111_v10 }
 0x52c   :  { %9916 = vmatmul.mubr.f32.vlgmr.msra.gmra.mrb[6].mxu0 %v11324_v28  ;;  %9893 = vmatprep.subr.mxu1 %v11111_v10 }
 0x52d   :  { %9919 = vmatpush3.xpose.msra.mxu0 %v2554_v33  ;;  %9920 = vmatprep.mubr.msk.f32.mxu0 %vm11112_vm1, %v11111_v10 }
 0x52e   :  { %9923 = vmatprep.subr.mxu0 %v11111_v10 }
 0x532   :  { %9891 = vmatmul.mubr.f32.vlgmr.msra.gmra.mrb[4].mxu1 %v2087_v38 }
 0x533   :  { %9894 = vmatpush3.msra.mxu1 %v11313_v23  ;;  %9895 = vmatprep.mubr.msk.f32.mxu1 %vm11112_vm1, %v11111_v10 }
 0x534   :  { %9921 = vmatmul.mubr.f32.vlgmr.msra.gmra.mrb[6].mxu0 %v2543_v32  ;;  %9898 = vmatprep.subr.mxu1 %v11111_v10 }
 0x535   :  { %9924 = vmatpush3.xpose.msra.mxu0 %v11322_v27  ;;  %9925 = vmatprep.mubr.msk.f32.mxu0 %vm11112_vm1, %v11111_v10 }
 0x536   :  { %9928 = vmatprep.subr.mxu0 %v11111_v10 }
 0x53a   :  { %9896 = vmatmul.mubr.f32.vlgmr.msra.gmra.mrb[4].mxu1 %v2088_v40 }
 0x53b   :  { %9899 = vmatpush3.msra.mxu1 %v2099_v36  ;;  %9900 = vmatprep.mubr.msk.f32.mxu1 %vm11112_vm1, %v11111_v10 }
 0x53c   :  { %9926 = vmatmul.mubr.f32.vlgmr.msra.gmra.mrb[6].mxu0 %v2544_v37  ;;  %9903 = vmatprep.subr.mxu1 %v11111_v10 }
 0x53d   :  { %9929 = vmatpush3.xpose.msra.mxu0 %v2555_v39  ;;  %9930 = vmatprep.mubr.msk.f32.mxu0 %vm11112_vm1, %v11111_v10 }
 0x53e   :  { %9933 = vmatprep.subr.mxu0 %v11111_v10 }
 0x542   :  { %9901 = vmatmul.mubr.f32.vlgmr.msra.gmra.mrb[4].mxu1 %v11330_v35 }
 0x543   :  { %9904 = vmatpush3.msra.mxu1 %v11313_v23  ;;  %9905 = vmatprep.mubr.msk.f32.mxu1 %vm11112_vm1, %v11111_v10 }
 0x544   :  { %9931 = vmatmul.mubr.f32.vlgmr.msra.gmra.mrb[6].mxu0 %v11324_v28  ;;  %9938 = vmatprep.subr.mxu1 %v11111_v10 }
 0x545   :  { %9934 = vmatpush3.xpose.msra.mxu0 %v11322_v27  ;;  %9935 = vmatprep.mubr.msk.f32.mxu0 %vm11112_vm1, %v11111_v10 }
 0x546   :  { %9968 = vmatprep.subr.mxu0 %v11111_v10 }
 0x54a   :  { %9906 = vmatmul.mubr.f32.vlgmr.msra.gmra.mrb[4].mxu1 %v11330_v35 }
 0x54b   :  { %9939 = vmatpush3.xpose.msra.mxu1 %v2931_v55  ;;  %9940 = vmatprep.mubr.msk.f32.mxu1 %vm11112_vm1, %v11111_v10 }
 0x54c   :  { %9936 = vmatmul.mubr.f32.vlgmr.msra.gmra.mrb[6].mxu0 %v11324_v28  ;;  %9943 = vmatprep.subr.mxu1 %v11111_v10 }
 0x54d   :  { %9970 = vmatprep.mubr.msk.f32.mxu0 %vm11112_vm1, %v11111_v10 }
 0x54e   :  { %9941 = vmatmul.mubr.f32.vlgmr.msra.gmra.mrb[6].mxu1 %v3000_v62 }
 0x54f   :  { %9944 = vmatpush3.xpose.msra.mxu1 %v3011_v63  ;;  %9945 = vmatprep.mubr.msk.f32.mxu1 %vm11112_vm1, %v11111_v10 }
 0x550   :  { %9948 = vmatprep.subr.mxu1 %v11111_v10 }
 0x556   :  { %9946 = vmatmul.mubr.f32.vlgmr.msra.gmra.mrb[6].mxu1 %v2996_v54 }
 0x557   :  { %9949 = vmatpush3.xpose.msra.mxu1 %v3008_v57  ;;  %9950 = vmatprep.mubr.msk.f32.mxu1 %vm11112_vm1, %v11111_v10 }
 0x558   :  { %9953 = vmatprep.subr.mxu1 %v11111_v10 }
 0x55e   :  { %9951 = vmatmul.mubr.f32.vlgmr.msra.gmra.mrb[6].mxu1 %v2997_v56 }
 0x55f   :  { %9954 = vmatpush3.xpose.msra.mxu1 %v2931_v55  ;;  %9955 = vmatprep.mubr.msk.f32.mxu1 %vm11112_vm1, %v11111_v10 }
 0x560   :  { %9958 = vmatprep.subr.mxu1 %v11111_v10 }
 0x566   :  { %9956 = vmatmul.mubr.f32.vlgmr.msra.gmra.mrb[6].mxu1 %v2998_v58 }
 0x567   :  { %9959 = vmatpush3.xpose.msra.mxu1 %v3009_v59  ;;  %9960 = vmatprep.mubr.msk.f32.mxu1 %vm11112_vm1, %v11111_v10 }
 0x568   :  { %9963 = vmatprep.subr.mxu1 %v11111_v10 }
 0x56e   :  { %9961 = vmatmul.mubr.f32.vlgmr.msra.gmra.mrb[6].mxu1 %v2996_v54 }
 0x56f   :  { %9964 = vmatpush3.xpose.msra.mxu1 %v2931_v55  ;;  %9965 = vmatprep.mubr.msk.f32.mxu1 %vm11112_vm1, %v11111_v10 }
 0x570   :  { %9998 = vmatprep.subr.mxu1 %v11111_v10 }
 0x576   :  { %9966 = vmatmul.mubr.f32.vlgmr.msra.gmra.mrb[6].mxu1 %v2996_v54 }
 0x577   :  { %10000 = vmatprep.mubr.msk.f32.mxu1 %vm11112_vm1, %v11111_v10 }
 0x5f3   :  { %v2010_v0 = vpop.f32.mrb[4].mxu0 }
 0x5f4   :  { %2466 = vst.msk [vmem:[#allocation2] sm:$0xff] %vm630_vm2, %v2010_v0  ;;  %v9877_v1 = vpop.f32.mrb[5].mxu0 }
 0x61d   :  { %v2462_v2 = vpop.f32.mrb[4].mxu1 }
 0x61e   :  { %2467 = vst.msk [vmem:[#allocation2 + $0x8] sm:$0xff] %vm630_vm2, %v2462_v2  ;;  %v9907_v3 = vpop.f32.mrb[5].mxu1 }
 0x61f   :  { %v2918_v4 = vpop.f32.mrb[6].mxu0 }
 0x620   :  { %v3376_v5 = vmul.f32 0.35355338, %v2918_v4  ;;  %v9937_v6 = vpop.f32.mrb[7].mxu0 }
 0x622   :  { %v3378_v7 = vsel %vm11284_vm3, %v3376_v5, -1e+30 }
 0x623   :  { %v3380_v8 = vsel %vm630_vm2, %v3378_v7, -inf }
 0x624   :  { %3381 = vmax.xlane.f32.xlu0 %v3380_v8 }
 0x649   :  { %v3372_v9 = vpop.f32.mrb[6].mxu1 }
 0x64a   :  { %v3377_v13 = vmul.f32 0.35355338, %v3372_v9  ;;  %v9967_v14 = vpop.f32.mrb[7].mxu1 }
 0x64c   :  { %v3379_v15 = vsel %vm11284_vm3, %v3377_v13, -1e+30 }
 0x64d   :  { %v3383_v16 = vsel %vm630_vm2, %v3379_v15, -inf }
 0x64e   :  { %3384 = vmax.xlane.f32.xlu1 %v3383_v16 }
 0x65f   :  { %3854 = vrot.lane.b32.xlu1 %v11236_v11, %s11117_s30 }
 0x663   :  { %4317 = vrot.lane.b32.xlu1 %v11239_v12, %s11118_s11 }
 0x667   :  { %4771 = vrot.lane.b32.xlu1 %v11236_v11, %s11118_s11 }
 0x66b   :  { %4773 = vrot.lane.b32.xlu1 %v11236_v11, %s11119_s12 }
 0x6b1   :  { %v3382_v17 = vpop.xlane.xlu0 %3381 }
 0x6b2   :  { %v3386_v18 = vsub.f32 %v3378_v7, %v3382_v17 }
 0x6b4   :  { %v3388_v19 = vmul.f32 1.442695, %v3386_v18 }
 0x6b6   :  { %11057 = vpow2.f32 %v3388_v19 }
 0x6c0   :  { %v11058_v20 = vpop.eup %11057 }
 0x6c1   :  { %v3392_v21 = vsel %vm630_vm2, %v11058_v20, 0.0 }
 0x6c2   :  { %3393 = vadd.xlane.f32.xlu0 %v3392_v21 }
 0x6db   :  { %v3385_v22 = vpop.xlane.xlu1 %3384 }
 0x6dc   :  { %v3387_v23 = vsub.f32 %v3379_v15, %v3385_v22 }
 0x6de   :  { %v3390_v24 = vmul.f32 1.442695, %v3387_v23 }
 0x6df   :  { %v3855_v25 = vpop.permute.xlu1 %3854 }
 0x6e0   :  { %11059 = vpow2.f32 %v3390_v24  ;;  %v11417_v26 = vand.u32 4294901760, %v3855_v25 }
 0x6e2   :  { %9999 = vmatpush3.msra.mxu1 %v11417_v26  ;;  %v3938_v45 = vsub.f32 %v3855_v25, %v11417_v26 }
 0x6e3   :  { %10003 = vmatprep.subr.mxu1 %v11111_v10  ;;  %v4318_v58 = vpop.permute.xlu1 %4317 }
 0x6e4   :  { %v3939_v51 = vand.u32 4294901760, %v3938_v45  ;;  %v4321_v60 = vsel %vm630_vm2, %v4318_v58, 0 }
 0x6e5   :  { %v11450_v62 = vand.u32 4294901760, %v4321_v60 }
 0x6e6   :  { %v3940_v54 = vsub.f32 %v3938_v45, %v3939_v51 }
 0x6e7   :  { %v4392_v0 = vsub.f32 %v4321_v60, %v11450_v62  ;;  %v4772_v2 = vpop.permute.xlu1 %4771 }
 0x6e8   :  { %v3941_v57 = vand.u32 4294901760, %v3940_v54  ;;  %v4775_v8 = vsel %vm630_vm2, %v4772_v2, 0 }
 0x6e9   :  { %v4393_v3 = vand.u32 4294901760, %v4392_v0  ;;  %v11476_v14 = vand.u32 4294901760, %v4775_v8 }
 0x6ea   :  { %v11060_v27 = vpop.eup %11059 }
 0x6eb   :  { %v3395_v28 = vsel %vm630_vm2, %v11060_v27, 0.0  ;;  %v4394_v5 = vsub.f32 %v4392_v0, %v4393_v3  ;;  %v4774_v6 = vpop.permute.xlu1 %4773  ;;  %v4846_v17 = vsub.f32 %v4775_v8, %v11476_v14 }
 0x6ec   :  { %3396 = vadd.xlane.f32.xlu0 %v3395_v28  ;;  %v4777_v9 = vsel %vm630_vm2, %v4774_v6, 0 }
 0x6ed   :  { %v4395_v13 = vand.u32 4294901760, %v4394_v5  ;;  %v4780_v16 = vand.u32 4294901760, %v4777_v9  ;;  %v4847_v19 = vand.u32 4294901760, %v4846_v17 }
 0x6ef   :  { %v4857_v18 = vsub.f32 %v4777_v9, %v4780_v16  ;;  %v4848_v21 = vsub.f32 %v4846_v17, %v4847_v19 }
 0x6f1   :  { %v4849_v23 = vand.u32 4294901760, %v4848_v21 }
 0x702   :  { %3402 = vrot.lane.b32.xlu0 %v11239_v12, %s11117_s30 }
 0x706   :  { %4319 = vrot.lane.b32.xlu0 %v11239_v12, %s11119_s12 }
 0x74f   :  { %v3394_v29 = vpop.xlane.xlu0 %3393 }
 0x750   :  { %11061 = vrcp.f32 %v3394_v29 }
 0x75a   :  { %v11062_v30 = vpop.eup %11061 }
 0x75b   :  { %v3399_v31 = vmul.f32 %v11062_v30, %v11058_v20  ;;  %v4858_v20 = vand.u32 4294901760, %v4857_v18 }
 0x75d   :  { %v3406_v32 = vsel %vm630_vm2, %v3399_v31, 0  ;;  %v4859_v22 = vsub.f32 %v4857_v18, %v4858_v20 }
 0x75e   :  { %v11425_v33 = vand.u32 4294901760, %v3406_v32 }
 0x75f   :  { %v4860_v24 = vand.u32 4294901760, %v4859_v22 }
 0x760   :  { %v3475_v34 = vsub.f32 %v3406_v32, %v11425_v33 }
 0x762   :  { %v3476_v35 = vand.u32 4294901760, %v3475_v34 }
 0x764   :  { %v3477_v37 = vsub.f32 %v3475_v34, %v3476_v35 }
 0x766   :  { %v3478_v40 = vand.u32 4294901760, %v3477_v37 }
 0x779   :  { %v3397_v36 = vpop.xlane.xlu0 %3396 }
 0x77a   :  { %11063 = vrcp.f32 %v3397_v36 }
 0x77d   :  { %v3403_v38 = vpop.permute.xlu0 %3402 }
 0x77e   :  { %v3409_v39 = vand.u32 4294901760, %v3403_v38 }
 0x780   :  { %v3486_v41 = vsub.f32 %v3403_v38, %v3409_v39  ;;  %9969 = vmatpush3.msra.mxu0 %v3409_v39 }
 0x781   :  { %9971 = vmatmul.mubr.f32.vlgmr.msra.gmra.mrb[8].mxu0 %v3478_v40  ;;  %9973 = vmatprep.subr.mxu0 %v11111_v10  ;;  %v4320_v59 = vpop.permute.xlu0 %4319 }
 0x782   :  { %v3487_v42 = vand.u32 4294901760, %v3486_v41  ;;  %9975 = vmatprep.mubr.msk.f32.mxu0 %vm11112_vm1, %v11111_v10  ;;  %v4323_v61 = vsel %vm630_vm2, %v4320_v59, 0 }
 0x783   :  { %v11454_v63 = vand.u32 4294901760, %v4323_v61 }
 0x784   :  { %v11064_v43 = vpop.eup %11063  ;;  %v3488_v44 = vsub.f32 %v3486_v41, %v3487_v42 }
 0x785   :  { %v3401_v46 = vmul.f32 %v11064_v43, %v11060_v27  ;;  %v4403_v1 = vsub.f32 %v4323_v61, %v11454_v63 }
 0x786   :  { %v3489_v48 = vand.u32 4294901760, %v3488_v44 }
 0x787   :  { %v3858_v49 = vsel %vm630_vm2, %v3401_v46, 0  ;;  %v4404_v4 = vand.u32 4294901760, %v4403_v1 }
 0x788   :  { %9974 = vmatpush3.msra.mxu0 %v3489_v48  ;;  %v11433_v50 = vand.u32 4294901760, %v3858_v49 }
 0x789   :  { %9976 = vmatmul.mubr.f32.vlgmr.msra.gmra.mrb[8].mxu0 %v11425_v33  ;;  %9978 = vmatprep.subr.mxu0 %v11111_v10  ;;  %v4405_v7 = vsub.f32 %v4403_v1, %v4404_v4 }
 0x78a   :  { %9979 = vmatpush3.msra.mxu0 %v3486_v41  ;;  %9980 = vmatprep.mubr.msk.f32.mxu0 %vm11112_vm1, %v11111_v10  ;;  %v3927_v52 = vsub.f32 %v3858_v49, %v11433_v50 }
 0x78b   :  { %9983 = vmatprep.subr.mxu0 %v11111_v10  ;;  %v4406_v15 = vand.u32 4294901760, %v4405_v7 }
 0x78c   :  { %v3928_v53 = vand.u32 4294901760, %v3927_v52 }
 0x78e   :  { %v3929_v55 = vsub.f32 %v3927_v52, %v3928_v53 }
 0x790   :  { %v3930_v56 = vand.u32 4294901760, %v3929_v55 }
 0x791   :  { %9981 = vmatmul.mubr.f32.vlgmr.msra.gmra.mrb[8].mxu0 %v3475_v34 }
 0x792   :  { %9984 = vmatpush3.msra.mxu0 %v3409_v39  ;;  %10001 = vmatmul.mubr.f32.vlgmr.msra.gmra.mrb[8].mxu1 %v3930_v56 }
 0x793   :  { %10004 = vmatpush3.msra.mxu1 %v3941_v57  ;;  %9985 = vmatprep.mubr.msk.f32.mxu0 %vm11112_vm1, %v11111_v10 }
 0x794   :  { %9988 = vmatprep.subr.mxu0 %v11111_v10  ;;  %10005 = vmatprep.mubr.msk.f32.mxu1 %vm11112_vm1, %v11111_v10 }
 0x795   :  { %10008 = vmatprep.subr.mxu1 %v11111_v10 }
 0x799   :  { %9986 = vmatmul.mubr.f32.vlgmr.msra.gmra.mrb[8].mxu0 %v3476_v35 }
 0x79a   :  { %9989 = vmatpush3.msra.mxu0 %v3487_v42  ;;  %10006 = vmatmul.mubr.f32.vlgmr.msra.gmra.mrb[8].mxu1 %v11433_v50 }
 0x79b   :  { %10009 = vmatpush3.msra.mxu1 %v3938_v45  ;;  %9990 = vmatprep.mubr.msk.f32.mxu0 %vm11112_vm1, %v11111_v10 }
 0x79c   :  { %9993 = vmatprep.subr.mxu0 %v11111_v10  ;;  %10010 = vmatprep.mubr.msk.f32.mxu1 %vm11112_vm1, %v11111_v10 }
 0x79d   :  { %10013 = vmatprep.subr.mxu1 %v11111_v10 }
 0x7a1   :  { %9991 = vmatmul.mubr.f32.vlgmr.msra.gmra.mrb[8].mxu0 %v11425_v33 }
 0x7a2   :  { %9994 = vmatpush3.msra.mxu0 %v3409_v39  ;;  %10011 = vmatmul.mubr.f32.vlgmr.msra.gmra.mrb[8].mxu1 %v3927_v52 }
 0x7a3   :  { %10014 = vmatpush3.msra.mxu1 %v11417_v26  ;;  %9995 = vmatprep.mubr.msk.f32.mxu0 %vm11112_vm1, %v11111_v10 }
 0x7a4   :  { %10028 = vmatprep.subr.mxu0 %v11111_v10  ;;  %10015 = vmatprep.mubr.msk.f32.mxu1 %vm11112_vm1, %v11111_v10 }
 0x7a5   :  { %10018 = vmatprep.subr.mxu1 %v11111_v10 }
 0x7a9   :  { %9996 = vmatmul.mubr.f32.vlgmr.msra.gmra.mrb[8].mxu0 %v11425_v33 }
 0x7aa   :  { %10029 = vmatpush3.xpose.msra.mxu0 %v11454_v63  ;;  %10016 = vmatmul.mubr.f32.vlgmr.msra.gmra.mrb[8].mxu1 %v3928_v53 }
 0x7ab   :  { %10019 = vmatpush3.msra.mxu1 %v3939_v51  ;;  %10030 = vmatprep.mubr.msk.f32.mxu0 %vm11112_vm1, %v11111_v10 }
 0x7ac   :  { %10033 = vmatprep.subr.mxu0 %v11111_v10  ;;  %10020 = vmatprep.mubr.msk.f32.mxu1 %vm11112_vm1, %v11111_v10 }
 0x7ad   :  { %10031 = vmatmul.mubr.f32.vlgmr.msra.gmra.mrb[10].mxu0 %v4395_v13  ;;  %10023 = vmatprep.subr.mxu1 %v11111_v10 }
 0x7ae   :  { %10034 = vmatpush3.xpose.msra.mxu0 %v4406_v15  ;;  %10035 = vmatprep.mubr.msk.f32.mxu0 %vm11112_vm1, %v11111_v10 }
 0x7af   :  { %10038 = vmatprep.subr.mxu0 %v11111_v10 }
 0x7b2   :  { %10021 = vmatmul.mubr.f32.vlgmr.msra.gmra.mrb[8].mxu1 %v11433_v50 }
 0x7b3   :  { %10024 = vmatpush3.msra.mxu1 %v11417_v26  ;;  %10025 = vmatprep.mubr.msk.f32.mxu1 %vm11112_vm1, %v11111_v10 }
 0x7b4   :  { %10058 = vmatprep.subr.mxu1 %v11111_v10 }
 0x7b5   :  { %10036 = vmatmul.mubr.f32.vlgmr.msra.gmra.mrb[10].mxu0 %v11450_v62 }
 0x7b6   :  { %10039 = vmatpush3.xpose.msra.mxu0 %v4403_v1  ;;  %10040 = vmatprep.mubr.msk.f32.mxu0 %vm11112_vm1, %v11111_v10 }
 0x7b7   :  { %10043 = vmatprep.subr.mxu0 %v11111_v10 }
 0x7ba   :  { %10026 = vmatmul.mubr.f32.vlgmr.msra.gmra.mrb[8].mxu1 %v11433_v50 }
 0x7bb   :  { %10059 = vmatpush3.xpose.msra.mxu1 %v4780_v16  ;;  %10060 = vmatprep.mubr.msk.f32.mxu1 %vm11112_vm1, %v11111_v10 }
 0x7bc   :  { %10063 = vmatprep.subr.mxu1 %v11111_v10 }
 0x7bd   :  { %10041 = vmatmul.mubr.f32.vlgmr.msra.gmra.mrb[10].mxu0 %v4392_v0 }
 0x7be   :  { %10044 = vmatpush3.xpose.msra.mxu0 %v11454_v63  ;;  %10061 = vmatmul.mubr.f32.vlgmr.msra.gmra.mrb[10].mxu1 %v4849_v23 }
 0x7bf   :  { %10064 = vmatpush3.xpose.msra.mxu1 %v4860_v24  ;;  %10045 = vmatprep.mubr.msk.f32.mxu0 %vm11112_vm1, %v11111_v10 }
 0x7c0   :  { %10048 = vmatprep.subr.mxu0 %v11111_v10  ;;  %10065 = vmatprep.mubr.msk.f32.mxu1 %vm11112_vm1, %v11111_v10 }
 0x7c1   :  { %10068 = vmatprep.subr.mxu1 %v11111_v10 }
 0x7c5   :  { %10046 = vmatmul.mubr.f32.vlgmr.msra.gmra.mrb[10].mxu0 %v4393_v3 }
 0x7c6   :  { %10049 = vmatpush3.xpose.msra.mxu0 %v4404_v4  ;;  %10066 = vmatmul.mubr.f32.vlgmr.msra.gmra.mrb[10].mxu1 %v11476_v14 }
 0x7c7   :  { %10069 = vmatpush3.xpose.msra.mxu1 %v4857_v18  ;;  %10050 = vmatprep.mubr.msk.f32.mxu0 %vm11112_vm1, %v11111_v10 }
 0x7c8   :  { %10053 = vmatprep.subr.mxu0 %v11111_v10  ;;  %10070 = vmatprep.mubr.msk.f32.mxu1 %vm11112_vm1, %v11111_v10 }
 0x7c9   :  { %10073 = vmatprep.subr.mxu1 %v11111_v10 }
 0x7cd   :  { %10051 = vmatmul.mubr.f32.vlgmr.msra.gmra.mrb[10].mxu0 %v11450_v62 }
 0x7ce   :  { %10054 = vmatpush3.xpose.msra.mxu0 %v11454_v63  ;;  %10071 = vmatmul.mubr.f32.vlgmr.msra.gmra.mrb[10].mxu1 %v4846_v17 }
 0x7cf   :  { %10074 = vmatpush3.xpose.msra.mxu1 %v4780_v16  ;;  %10055 = vmatprep.mubr.msk.f32.mxu0 %vm11112_vm1, %v11111_v10 }
 0x7d0   :  { %10075 = vmatprep.mubr.msk.f32.mxu1 %vm11112_vm1, %v11111_v10  ;;  %10078 = vmatprep.subr.mxu1 %v11111_v10 }
 0x7d1   :  { %10088 = vmatprep.subr.mxu0 %v11111_v10 }
 0x7d5   :  { %10056 = vmatmul.mubr.f32.vlgmr.msra.gmra.mrb[10].mxu0 %v11450_v62 }
 0x7d6   :  { %10076 = vmatmul.mubr.f32.vlgmr.msra.gmra.mrb[10].mxu1 %v4847_v19  ;;  %10090 = vmatprep.mubr.msk.f32.mxu0 %vm11112_vm1, %v11111_v10 }
 0x7d7   :  { %10079 = vmatpush3.xpose.msra.mxu1 %v4858_v20  ;;  %10080 = vmatprep.mubr.msk.f32.mxu1 %vm11112_vm1, %v11111_v10 }
 0x7d8   :  { %10083 = vmatprep.subr.mxu1 %v11111_v10 }
 0x7de   :  { %10081 = vmatmul.mubr.f32.vlgmr.msra.gmra.mrb[10].mxu1 %v11476_v14 }
 0x7df   :  { %10084 = vmatpush3.xpose.msra.mxu1 %v4780_v16  ;;  %10085 = vmatprep.mubr.msk.f32.mxu1 %vm11112_vm1, %v11111_v10 }
 0x7e0   :  { %10118 = vmatprep.subr.mxu1 %v11111_v10 }
 0x7e6   :  { %10086 = vmatmul.mubr.f32.vlgmr.msra.gmra.mrb[10].mxu1 %v11476_v14 }
 0x7e7   :  { %10120 = vmatprep.mubr.msk.f32.mxu1 %vm11112_vm1, %v11111_v10 }
 0x87c   :  { %v11534_v25 = vpop.f32.mrb[8].mxu0 }
 0x87d   :  { %v9997_v26 = vpop.f32.mrb[9].mxu0 }
 0x88d   :  { %v11536_v27 = vpop.f32.mrb[8].mxu1 }
 0x88e   :  { %v10027_v28 = vpop.f32.mrb[9].mxu1 }
 0x8a8   :  { %v4767_v29 = vpop.f32.mrb[10].mxu0 }
 0x8a9   :  { %v5225_v30 = vmul.f32 0.35355338, %v4767_v29  ;;  %v10057_v31 = vpop.f32.mrb[11].mxu0 }
 0x8ab   :  { %v5227_v32 = vsel %vm11284_vm3, %v5225_v30, -1e+30 }
 0x8ac   :  { %v5229_v33 = vsel %vm630_vm2, %v5227_v32, -inf }
 0x8ad   :  { %5230 = vmax.xlane.f32.xlu0 %v5229_v33 }
 0x8b9   :  { %v5221_v34 = vpop.f32.mrb[10].mxu1 }
 0x8ba   :  { %v5226_v35 = vmul.f32 0.35355338, %v5221_v34  ;;  %v10087_v36 = vpop.f32.mrb[11].mxu1 }
 0x8bc   :  { %v5228_v37 = vsel %vm11284_vm3, %v5226_v35, -1e+30 }
 0x8bd   :  { %v5232_v38 = vsel %vm630_vm2, %v5228_v37, -inf }
 0x8be   :  { %5233 = vmax.xlane.f32.xlu1 %v5232_v38 }
 0x8cf   :  { %5703 = vrot.lane.b32.xlu1 %v11236_v11, %s11120_s13 }
 0x8d3   :  { %6166 = vrot.lane.b32.xlu1 %v11239_v12, %s11121_s14 }
 0x8d7   :  { %6620 = vrot.lane.b32.xlu1 %v11236_v11, %s11121_s14 }
 0x8db   :  { %6622 = vrot.lane.b32.xlu1 %v11236_v11, %s11122_s15 }
 0x93a   :  { %v5231_v39 = vpop.xlane.xlu0 %5230 }
 0x93b   :  { %v5235_v40 = vsub.f32 %v5227_v32, %v5231_v39 }
 0x93d   :  { %v5237_v41 = vmul.f32 1.442695, %v5235_v40 }
 0x93f   :  { %11065 = vpow2.f32 %v5237_v41 }
 0x949   :  { %v11066_v42 = vpop.eup %11065 }
 0x94a   :  { %v5241_v43 = vsel %vm630_vm2, %v11066_v42, 0.0 }
 0x94b   :  { %v5234_v44 = vpop.xlane.xlu1 %5233  ;;  %5242 = vadd.xlane.f32.xlu0 %v5241_v43 }
 0x94c   :  { %v5236_v45 = vsub.f32 %v5228_v37, %v5234_v44 }
 0x94e   :  { %v5239_v46 = vmul.f32 1.442695, %v5236_v45 }
 0x94f   :  { %v5704_v48 = vpop.permute.xlu1 %5703 }
 0x950   :  { %11067 = vpow2.f32 %v5239_v46  ;;  %v11549_v49 = vand.u32 4294901760, %v5704_v48 }
 0x952   :  { %10119 = vmatpush3.msra.mxu1 %v11549_v49  ;;  %v5787_v4 = vsub.f32 %v5704_v48, %v11549_v49 }
 0x953   :  { %10123 = vmatprep.subr.mxu1 %v11111_v10  ;;  %v6167_v19 = vpop.permute.xlu1 %6166 }
 0x954   :  { %v5788_v9 = vand.u32 4294901760, %v5787_v4  ;;  %v6170_v21 = vsel %vm630_vm2, %v6167_v19, 0 }
 0x955   :  { %v11582_v23 = vand.u32 4294901760, %v6170_v21 }
 0x956   :  { %v5789_v15 = vsub.f32 %v5787_v4, %v5788_v9 }
 0x957   :  { %v6241_v26 = vsub.f32 %v6170_v21, %v11582_v23  ;;  %v6621_v29 = vpop.permute.xlu1 %6620 }
 0x958   :  { %v5790_v18 = vand.u32 4294901760, %v5789_v15  ;;  %v6624_v35 = vsel %vm630_vm2, %v6621_v29, 0 }
 0x959   :  { %v6242_v30 = vand.u32 4294901760, %v6241_v26  ;;  %v11608_v38 = vand.u32 4294901760, %v6624_v35 }
 0x95a   :  { %v11068_v50 = vpop.eup %11067 }
 0x95b   :  { %v5244_v51 = vsel %vm630_vm2, %v11068_v50, 0.0  ;;  %v6243_v32 = vsub.f32 %v6241_v26, %v6242_v30  ;;  %v6623_v33 = vpop.permute.xlu1 %6622  ;;  %v6695_v41 = vsub.f32 %v6624_v35, %v11608_v38 }
 0x95c   :  { %5245 = vadd.xlane.f32.xlu0 %v5244_v51  ;;  %v6626_v36 = vsel %vm630_vm2, %v6623_v33, 0 }
 0x95d   :  { %v6244_v37 = vand.u32 4294901760, %v6243_v32  ;;  %v6629_v40 = vand.u32 4294901760, %v6626_v36  ;;  %v6696_v43 = vand.u32 4294901760, %v6695_v41 }
 0x95f   :  { %v6697_v45 = vsub.f32 %v6695_v41, %v6696_v43 }
 0x961   :  { %v6698_v48 = vand.u32 4294901760, %v6697_v45 }
 0x972   :  { %5251 = vrot.lane.b32.xlu0 %v11239_v12, %s11120_s13 }
 0x976   :  { %6168 = vrot.lane.b32.xlu0 %v11239_v12, %s11122_s15 }
 0x9d8   :  { %v5243_v52 = vpop.xlane.xlu0 %5242 }
 0x9d9   :  { %11069 = vrcp.f32 %v5243_v52 }
 0x9e3   :  { %v11070_v53 = vpop.eup %11069 }
 0x9e4   :  { %v5248_v54 = vmul.f32 %v11070_v53, %v11066_v42  ;;  %v6706_v42 = vsub.f32 %v6626_v36, %v6629_v40 }
 0x9e6   :  { %v5255_v55 = vsel %vm630_vm2, %v5248_v54, 0  ;;  %v6707_v44 = vand.u32 4294901760, %v6706_v42 }
 0x9e7   :  { %v11557_v56 = vand.u32 4294901760, %v5255_v55 }
 0x9e8   :  { %v6708_v46 = vsub.f32 %v6706_v42, %v6707_v44 }
 0x9e9   :  { %v5246_v57 = vpop.xlane.xlu0 %5245  ;;  %v5324_v58 = vsub.f32 %v5255_v55, %v11557_v56 }
 0x9ea   :  { %11071 = vrcp.f32 %v5246_v57 }
 0x9eb   :  { %v5325_v59 = vand.u32 4294901760, %v5324_v58 }
 0x9ed   :  { %v5252_v60 = vpop.permute.xlu0 %5251  ;;  %v5326_v61 = vsub.f32 %v5324_v58, %v5325_v59 }
 0x9ee   :  { %v5258_v62 = vand.u32 4294901760, %v5252_v60 }
 0x9ef   :  { %v5327_v63 = vand.u32 4294901760, %v5326_v61 }
 0x9f0   :  { %v5335_v0 = vsub.f32 %v5252_v60, %v5258_v62  ;;  %10089 = vmatpush3.msra.mxu0 %v5258_v62 }
 0x9f1   :  { %10091 = vmatmul.mubr.f32.vlgmr.msra.gmra.mrb[12].mxu0 %v5327_v63  ;;  %10093 = vmatprep.subr.mxu0 %v11111_v10  ;;  %v6169_v20 = vpop.permute.xlu0 %6168 }
 0x9f2   :  { %v5336_v1 = vand.u32 4294901760, %v5335_v0  ;;  %10095 = vmatprep.mubr.msk.f32.mxu0 %vm11112_vm1, %v11111_v10  ;;  %v6172_v22 = vsel %vm630_vm2, %v6169_v20, 0 }
 0x9f3   :  { %v11586_v24 = vand.u32 4294901760, %v6172_v22 }
 0x9f4   :  { %v11072_v2 = vpop.eup %11071  ;;  %v5337_v3 = vsub.f32 %v5335_v0, %v5336_v1 }
 0x9f5   :  { %v5250_v5 = vmul.f32 %v11072_v2, %v11068_v50  ;;  %v6252_v28 = vsub.f32 %v6172_v22, %v11586_v24 }
 0x9f6   :  { %v5338_v6 = vand.u32 4294901760, %v5337_v3 }
 0x9f7   :  { %v5707_v7 = vsel %vm630_vm2, %v5250_v5, 0  ;;  %v6253_v31 = vand.u32 4294901760, %v6252_v28 }
 0x9f8   :  { %10094 = vmatpush3.msra.mxu0 %v5338_v6  ;;  %v11565_v8 = vand.u32 4294901760, %v5707_v7 }
 0x9f9   :  { %10096 = vmatmul.mubr.f32.vlgmr.msra.gmra.mrb[12].mxu0 %v11557_v56  ;;  %10098 = vmatprep.subr.mxu0 %v11111_v10  ;;  %v6254_v34 = vsub.f32 %v6252_v28, %v6253_v31 }
 0x9fa   :  { %10099 = vmatpush3.msra.mxu0 %v5335_v0  ;;  %10100 = vmatprep.mubr.msk.f32.mxu0 %vm11112_vm1, %v11111_v10  ;;  %v5776_v13 = vsub.f32 %v5707_v7, %v11565_v8 }
 0x9fb   :  { %10103 = vmatprep.subr.mxu0 %v11111_v10  ;;  %v6255_v39 = vand.u32 4294901760, %v6254_v34 }
 0x9fc   :  { %v5777_v14 = vand.u32 4294901760, %v5776_v13 }
 0x9fe   :  { %v5778_v16 = vsub.f32 %v5776_v13, %v5777_v14 }
 0xa00   :  { %v5779_v17 = vand.u32 4294901760, %v5778_v16 }
 0xa01   :  { %10101 = vmatmul.mubr.f32.vlgmr.msra.gmra.mrb[12].mxu0 %v5324_v58 }
 0xa02   :  { %10104 = vmatpush3.msra.mxu0 %v5258_v62  ;;  %10121 = vmatmul.mubr.f32.vlgmr.msra.gmra.mrb[12].mxu1 %v5779_v17 }
 0xa03   :  { %10124 = vmatpush3.msra.mxu1 %v5790_v18  ;;  %10105 = vmatprep.mubr.msk.f32.mxu0 %vm11112_vm1, %v11111_v10 }
 0xa04   :  { %10108 = vmatprep.subr.mxu0 %v11111_v10  ;;  %10125 = vmatprep.mubr.msk.f32.mxu1 %vm11112_vm1, %v11111_v10 }
 0xa05   :  { %10128 = vmatprep.subr.mxu1 %v11111_v10 }
 0xa09   :  { %10106 = vmatmul.mubr.f32.vlgmr.msra.gmra.mrb[12].mxu0 %v5325_v59 }
 0xa0a   :  { %10109 = vmatpush3.msra.mxu0 %v5336_v1  ;;  %10126 = vmatmul.mubr.f32.vlgmr.msra.gmra.mrb[12].mxu1 %v11565_v8 }
 0xa0b   :  { %10129 = vmatpush3.msra.mxu1 %v5787_v4  ;;  %10110 = vmatprep.mubr.msk.f32.mxu0 %vm11112_vm1, %v11111_v10 }
 0xa0c   :  { %10113 = vmatprep.subr.mxu0 %v11111_v10  ;;  %10130 = vmatprep.mubr.msk.f32.mxu1 %vm11112_vm1, %v11111_v10 }
 0xa0d   :  { %10133 = vmatprep.subr.mxu1 %v11111_v10 }
 0xa11   :  { %10111 = vmatmul.mubr.f32.vlgmr.msra.gmra.mrb[12].mxu0 %v11557_v56 }
 0xa12   :  { %10114 = vmatpush3.msra.mxu0 %v5258_v62  ;;  %10131 = vmatmul.mubr.f32.vlgmr.msra.gmra.mrb[12].mxu1 %v5776_v13 }
 0xa13   :  { %10134 = vmatpush3.msra.mxu1 %v11549_v49  ;;  %10115 = vmatprep.mubr.msk.f32.mxu0 %vm11112_vm1, %v11111_v10 }
 0xa14   :  { %10148 = vmatprep.subr.mxu0 %v11111_v10  ;;  %10135 = vmatprep.mubr.msk.f32.mxu1 %vm11112_vm1, %v11111_v10 }
 0xa15   :  { %10138 = vmatprep.subr.mxu1 %v11111_v10 }
 0xa19   :  { %10116 = vmatmul.mubr.f32.vlgmr.msra.gmra.mrb[12].mxu0 %v11557_v56 }
 0xa1a   :  { %10149 = vmatpush3.xpose.msra.mxu0 %v11586_v24  ;;  %10136 = vmatmul.mubr.f32.vlgmr.msra.gmra.mrb[12].mxu1 %v5777_v14 }
 0xa1b   :  { %10139 = vmatpush3.msra.mxu1 %v5788_v9  ;;  %10150 = vmatprep.mubr.msk.f32.mxu0 %vm11112_vm1, %v11111_v10 }
 0xa1c   :  { %10153 = vmatprep.subr.mxu0 %v11111_v10  ;;  %10140 = vmatprep.mubr.msk.f32.mxu1 %vm11112_vm1, %v11111_v10 }
 0xa1d   :  { %10151 = vmatmul.mubr.f32.vlgmr.msra.gmra.mrb[14].mxu0 %v6244_v37  ;;  %10143 = vmatprep.subr.mxu1 %v11111_v10 }
 0xa1e   :  { %10154 = vmatpush3.xpose.msra.mxu0 %v6255_v39  ;;  %10155 = vmatprep.mubr.msk.f32.mxu0 %vm11112_vm1, %v11111_v10 }
 0xa1f   :  { %10158 = vmatprep.subr.mxu0 %v11111_v10 }
 0xa22   :  { %10141 = vmatmul.mubr.f32.vlgmr.msra.gmra.mrb[12].mxu1 %v11565_v8 }
 0xa23   :  { %10144 = vmatpush3.msra.mxu1 %v11549_v49  ;;  %10145 = vmatprep.mubr.msk.f32.mxu1 %vm11112_vm1, %v11111_v10  ;;  %v6709_v49 = vand.u32 4294901760, %v6708_v46 }
 0xa24   :  { %10178 = vmatprep.subr.mxu1 %v11111_v10 }
 0xa25   :  { %10156 = vmatmul.mubr.f32.vlgmr.msra.gmra.mrb[14].mxu0 %v11582_v23 }
 0xa26   :  { %10159 = vmatpush3.xpose.msra.mxu0 %v6252_v28  ;;  %10160 = vmatprep.mubr.msk.f32.mxu0 %vm11112_vm1, %v11111_v10 }
 0xa27   :  { %10163 = vmatprep.subr.mxu0 %v11111_v10 }
 0xa2a   :  { %10146 = vmatmul.mubr.f32.vlgmr.msra.gmra.mrb[12].mxu1 %v11565_v8 }
 0xa2b   :  { %10179 = vmatpush3.xpose.msra.mxu1 %v6629_v40  ;;  %10180 = vmatprep.mubr.msk.f32.mxu1 %vm11112_vm1, %v11111_v10 }
 0xa2c   :  { %10183 = vmatprep.subr.mxu1 %v11111_v10 }
 0xa2d   :  { %10161 = vmatmul.mubr.f32.vlgmr.msra.gmra.mrb[14].mxu0 %v6241_v26 }
 0xa2e   :  { %10164 = vmatpush3.xpose.msra.mxu0 %v11586_v24  ;;  %10181 = vmatmul.mubr.f32.vlgmr.msra.gmra.mrb[14].mxu1 %v6698_v48 }
 0xa2f   :  { %10184 = vmatpush3.xpose.msra.mxu1 %v6709_v49  ;;  %10165 = vmatprep.mubr.msk.f32.mxu0 %vm11112_vm1, %v11111_v10 }
 0xa30   :  { %10168 = vmatprep.subr.mxu0 %v11111_v10  ;;  %10185 = vmatprep.mubr.msk.f32.mxu1 %vm11112_vm1, %v11111_v10 }
 0xa31   :  { %10188 = vmatprep.subr.mxu1 %v11111_v10 }
 0xa35   :  { %10166 = vmatmul.mubr.f32.vlgmr.msra.gmra.mrb[14].mxu0 %v6242_v30 }
 0xa36   :  { %10169 = vmatpush3.xpose.msra.mxu0 %v6253_v31  ;;  %10186 = vmatmul.mubr.f32.vlgmr.msra.gmra.mrb[14].mxu1 %v11608_v38 }
 0xa37   :  { %10189 = vmatpush3.xpose.msra.mxu1 %v6706_v42  ;;  %10170 = vmatprep.mubr.msk.f32.mxu0 %vm11112_vm1, %v11111_v10 }
 0xa38   :  { %10173 = vmatprep.subr.mxu0 %v11111_v10  ;;  %10190 = vmatprep.mubr.msk.f32.mxu1 %vm11112_vm1, %v11111_v10 }
 0xa39   :  { %10193 = vmatprep.subr.mxu1 %v11111_v10 }
 0xa3d   :  { %10171 = vmatmul.mubr.f32.vlgmr.msra.gmra.mrb[14].mxu0 %v11582_v23 }
 0xa3e   :  { %10174 = vmatpush3.xpose.msra.mxu0 %v11586_v24  ;;  %10191 = vmatmul.mubr.f32.vlgmr.msra.gmra.mrb[14].mxu1 %v6695_v41 }
 0xa3f   :  { %10194 = vmatpush3.xpose.msra.mxu1 %v6629_v40  ;;  %10175 = vmatprep.mubr.msk.f32.mxu0 %vm11112_vm1, %v11111_v10 }
 0xa40   :  { %10195 = vmatprep.mubr.msk.f32.mxu1 %vm11112_vm1, %v11111_v10  ;;  %10198 = vmatprep.subr.mxu1 %v11111_v10 }
 0xa41   :  { %10208 = vmatprep.subr.mxu0 %v11111_v10 }
 0xa45   :  { %10176 = vmatmul.mubr.f32.vlgmr.msra.gmra.mrb[14].mxu0 %v11582_v23 }
 0xa46   :  { %10196 = vmatmul.mubr.f32.vlgmr.msra.gmra.mrb[14].mxu1 %v6696_v43  ;;  %10210 = vmatprep.mubr.msk.f32.mxu0 %vm11112_vm1, %v11111_v10 }
 0xa47   :  { %10199 = vmatpush3.xpose.msra.mxu1 %v6707_v44  ;;  %10200 = vmatprep.mubr.msk.f32.mxu1 %vm11112_vm1, %v11111_v10 }
 0xa48   :  { %10203 = vmatprep.subr.mxu1 %v11111_v10 }
 0xa4e   :  { %10201 = vmatmul.mubr.f32.vlgmr.msra.gmra.mrb[14].mxu1 %v11608_v38 }
 0xa4f   :  { %10204 = vmatpush3.xpose.msra.mxu1 %v6629_v40  ;;  %10205 = vmatprep.mubr.msk.f32.mxu1 %vm11112_vm1, %v11111_v10 }
 0xa50   :  { %10238 = vmatprep.subr.mxu1 %v11111_v10 }
 0xa56   :  { %10206 = vmatmul.mubr.f32.vlgmr.msra.gmra.mrb[14].mxu1 %v11608_v38 }
 0xa57   :  { %10240 = vmatprep.mubr.msk.f32.mxu1 %vm11112_vm1, %v11111_v10 }
 0xaec   :  { %v5699_v50 = vpop.f32.mrb[12].mxu0 }
 0xaed   :  { %v10117_v51 = vpop.f32.mrb[13].mxu0 }
 0xaee   :  { %v11085_v51 = vld [vmem:[%s12074_s0] sm:$0xff] }
 0xafd   :  { %v6151_v52 = vpop.f32.mrb[12].mxu1 }
 0xafe   :  { %v10147_v53 = vpop.f32.mrb[13].mxu1 }
 0xb18   :  { %v6616_v54 = vpop.f32.mrb[14].mxu0 }
 0xb19   :  { %v7074_v55 = vmul.f32 0.35355338, %v6616_v54  ;;  %v10177_v56 = vpop.f32.mrb[15].mxu0 }
 0xb1b   :  { %v7076_v57 = vsel %vm11284_vm3, %v7074_v55, -1e+30  ;;  %v11086_v55 = vld [vmem:[%s12074_s0 + $0x8] sm:$0xff] }
 0xb1c   :  { %v7078_v58 = vsel %vm630_vm2, %v7076_v57, -inf }
 0xb1d   :  { %7079 = vmax.xlane.f32.xlu0 %v7078_v58 }
 0xb29   :  { %v7070_v59 = vpop.f32.mrb[14].mxu1 }
 0xb2a   :  { %v7075_v60 = vmul.f32 0.35355338, %v7070_v59  ;;  %v10207_v61 = vpop.f32.mrb[15].mxu1 }
 0xb2c   :  { %v7077_v62 = vsel %vm11284_vm3, %v7075_v60, -1e+30 }
 0xb2d   :  { %v7081_v63 = vsel %vm630_vm2, %v7077_v62, -inf }
 0xb2e   :  { %7082 = vmax.xlane.f32.xlu1 %v7081_v63 }
 0xb3f   :  { %7552 = vrot.lane.b32.xlu1 %v11236_v11, %s11123_s16 }
 0xb43   :  { %4308 = vrot.lane.b32.xlu1 %v11534_v25, %s11124_s17 }
 0xb47   :  { %4310 = vrot.lane.b32.xlu1 %v11536_v27, %s11124_s17 }
 0xb4b   :  { %6159 = vrot.lane.b32.xlu1 %v6151_v52, %s11125_s18 }
 0xbaa   :  { %v7080_v0 = vpop.xlane.xlu0 %7079 }
 0xbab   :  { %v7084_v1 = vsub.f32 %v7076_v57, %v7080_v0 }
 0xbad   :  { %v7086_v47 = vmul.f32 1.442695, %v7084_v1 }
 0xbaf   :  { %11073 = vpow2.f32 %v7086_v47 }
 0xbb9   :  { %v11074_v2 = vpop.eup %11073 }
 0xbba   :  { %v7090_v3 = vsel %vm630_vm2, %v11074_v2, 0.0 }
 0xbbb   :  { %v7083_v4 = vpop.xlane.xlu1 %7082  ;;  %7091 = vadd.xlane.f32.xlu0 %v7090_v3  ;;  %v8063_v3 = vld [vmem:[%s12080_s6] sm:$0xff] }
 0xbbc   :  { %v7085_v5 = vsub.f32 %v7077_v62, %v7083_v4  ;;  %v8064_v4 = vld [vmem:[%s12080_s6 + $0x8] sm:$0xff] }
 0xbbe   :  { %v7088_v11 = vmul.f32 1.442695, %v7085_v5  ;;  %v8065_v5 = vld [vmem:[%s12080_s6 + $0x10] sm:$0xff] }
 0xbbf   :  { %v7553_v6 = vpop.permute.xlu1 %7552 }
 0xbc0   :  { %11075 = vpow2.f32 %v7088_v11  ;;  %v11679_v7 = vand.u32 4294901760, %v7553_v6  ;;  %v8081_v11 = vand.u32 4294901760, %v8063_v3 }
 0xbc2   :  { %10239 = vmatpush3.msra.mxu1 %v11679_v7  ;;  %v7636_v32 = vsub.f32 %v7553_v6, %v11679_v7  ;;  %v8084_v6 = vand.u32 4294901760, %v8064_v4 }
 0xbc3   :  { %v4309_v25 = vpop.permute.xlu1 %4308  ;;  %10243 = vmatprep.subr.mxu1 %v11111_v10 }
 0xbc4   :  { %4315 = vst.msk [vmem:[#allocation2] sm:$0xff] %vm4314_vm4, %v4309_v25  ;;  %v7637_v37 = vand.u32 4294901760, %v7636_v32  ;;  %v8087_v25 = vand.u32 4294901760, %v8065_v5 }
 0xbc6   :  { %v7638_v40 = vsub.f32 %v7636_v32, %v7637_v37 }
 0xbc7   :  { %v4311_v27 = vpop.permute.xlu1 %4310 }
 0xbc8   :  { %4316 = vst.msk [vmem:[#allocation2 + $0x8] sm:$0xff] %vm4314_vm4, %v4311_v27  ;;  %v7639_v43 = vand.u32 4294901760, %v7638_v40 }
 0xbca   :  { %v11076_v8 = vpop.eup %11075 }
 0xbcb   :  { %v6160_v9 = vpop.permute.xlu1 %6159  ;;  %v7093_v13 = vsel %vm630_vm2, %v11076_v8, 0.0 }
 0xbcc   :  { %6165 = vst.msk [vmem:[#allocation2 + $0x8] sm:$0xff] %vm6163_vm5, %v6160_v9  ;;  %7094 = vadd.xlane.f32.xlu0 %v7093_v13  ;;  %v8171_v13 = vsub.f32 %v8063_v3, %v8081_v11 }
 0xbe2   :  { %7100 = vrot.lane.b32.xlu0 %v11239_v12, %s11123_s16 }
 0xbe6   :  { %6157 = vrot.lane.b32.xlu0 %v5699_v50, %s11125_s18 }
 0xc48   :  { %v7092_v14 = vpop.xlane.xlu0 %7091 }
 0xc49   :  { %11077 = vrcp.f32 %v7092_v14  ;;  %v8178_v14 = vsub.f32 %v8064_v4, %v8084_v6 }
 0xc53   :  { %v11078_v15 = vpop.eup %11077 }
 0xc54   :  { %v7097_v16 = vmul.f32 %v11078_v15, %v11074_v2  ;;  %v8172_v15 = vand.u32 4294901760, %v8171_v13 }
 0xc56   :  { %v7104_v17 = vsel %vm630_vm2, %v7097_v16, 0  ;;  %v8179_v16 = vand.u32 4294901760, %v8178_v14 }
 0xc57   :  { %v7172_v18 = vand.u32 4294901760, %v7104_v17 }
 0xc59   :  { %v7095_v19 = vpop.xlane.xlu0 %7094  ;;  %v7173_v20 = vsub.f32 %v7104_v17, %v7172_v18  ;;  %v8173_v17 = vsub.f32 %v8171_v13, %v8172_v15 }
 0xc5a   :  { %11079 = vrcp.f32 %v7095_v19  ;;  %v8185_v19 = vsub.f32 %v8065_v5, %v8087_v25 }
 0xc5b   :  { %v7174_v21 = vand.u32 4294901760, %v7173_v20 }
 0xc5d   :  { %v7101_v22 = vpop.permute.xlu0 %7100  ;;  %v7175_v23 = vsub.f32 %v7173_v20, %v7174_v21 }
 0xc5e   :  { %v7107_v24 = vand.u32 4294901760, %v7101_v22 }
 0xc5f   :  { %v7176_v26 = vand.u32 4294901760, %v7175_v23  ;;  %v8186_v23 = vand.u32 4294901760, %v8185_v19 }
 0xc60   :  { %v7184_v28 = vsub.f32 %v7101_v22, %v7107_v24  ;;  %10209 = vmatpush3.msra.mxu0 %v7107_v24 }
 0xc61   :  { %10211 = vmatmul.mubr.f32.vlgmr.msra.gmra.mrb[16].mxu0 %v7176_v26  ;;  %v6158_v12 = vpop.permute.xlu0 %6157  ;;  %10213 = vmatprep.subr.mxu0 %v11111_v10 }
 0xc62   :  { %v7185_v29 = vand.u32 4294901760, %v7184_v28  ;;  %6164 = vst.msk [vmem:[#allocation2] sm:$0xff] %vm6163_vm5, %v6158_v12  ;;  %10215 = vmatprep.mubr.msk.f32.mxu0 %vm11112_vm1, %v11111_v10 }
 0xc64   :  { %v11080_v30 = vpop.eup %11079  ;;  %v7186_v31 = vsub.f32 %v7184_v28, %v7185_v29 }
 0xc65   :  { %v7099_v33 = vmul.f32 %v11080_v30, %v11076_v8  ;;  %v11760_v8 = vpack.c.bf16 %v8084_v6, %v8081_v11  ;;  %v8618_v11 = vld [vmem:[%s12082_s8 + $0x40] sm:$0xff]  ;;  %v8619_v6 = vld [vmem:[%s12082_s8 + $0x48] sm:$0xff] }
 0xc66   :  { %v7187_v34 = vand.u32 4294901760, %v7186_v31 }
 0xc67   :  { %v7556_v35 = vsel %vm630_vm2, %v7099_v33, 0 }
 0xc68   :  { %10214 = vmatpush3.msra.mxu0 %v7187_v34  ;;  %v7624_v36 = vand.u32 4294901760, %v7556_v35  ;;  %v11777_v34 = vpack.c.bf16 %v8179_v16, %v8172_v15 }
 0xc69   :  { %10216 = vmatmul.mubr.f32.vlgmr.msra.gmra.mrb[16].mxu0 %v7172_v18  ;;  %10218 = vmatprep.subr.mxu0 %v11111_v10 }
 0xc6a   :  { %10219 = vmatpush3.msra.mxu0 %v7184_v28  ;;  %10220 = vmatprep.mubr.msk.f32.mxu0 %vm11112_vm1, %v11111_v10  ;;  %v7625_v38 = vsub.f32 %v7556_v35, %v7624_v36  ;;  %v8187_v28 = vsub.f32 %v8185_v19, %v8186_v23 }
 0xc6b   :  { %10223 = vmatprep.subr.mxu0 %v11111_v10 }
 0xc6c   :  { %v7626_v39 = vand.u32 4294901760, %v7625_v38 }
 0xc6e   :  { %v7627_v41 = vsub.f32 %v7625_v38, %v7626_v39 }
 0xc70   :  { %v7628_v42 = vand.u32 4294901760, %v7627_v41  ;;  %v8613_v41 = vld [vmem:[%s12082_s8 + $0x18] sm:$0xff] }
 0xc71   :  { %10221 = vmatmul.mubr.f32.vlgmr.msra.gmra.mrb[16].mxu0 %v7173_v20 }
 0xc72   :  { %10224 = vmatpush3.msra.mxu0 %v7107_v24  ;;  %10241 = vmatmul.mubr.f32.vlgmr.msra.gmra.mrb[16].mxu1 %v7628_v42 }
 0xc73   :  { %10244 = vmatpush3.msra.mxu1 %v7639_v43  ;;  %10225 = vmatprep.mubr.msk.f32.mxu0 %vm11112_vm1, %v11111_v10  ;;  %v8614_v43 = vld [vmem:[%s12082_s8 + $0x20] sm:$0xff] }
 0xc74   :  { %10228 = vmatprep.subr.mxu0 %v11111_v10  ;;  %10245 = vmatprep.mubr.msk.f32.mxu1 %vm11112_vm1, %v11111_v10 }
 0xc75   :  { %10248 = vmatprep.subr.mxu1 %v11111_v10 }
 0xc79   :  { %10226 = vmatmul.mubr.f32.vlgmr.msra.gmra.mrb[16].mxu0 %v7174_v21  ;;  %v8174_v21 = vand.u32 4294901760, %v8173_v17  ;;  %v8621_v17 = vld [vmem:[%s12082_s8 + $0x58] sm:$0xff] }
 0xc7a   :  { %10229 = vmatpush3.msra.mxu0 %v7185_v29  ;;  %10246 = vmatmul.mubr.f32.vlgmr.msra.gmra.mrb[16].mxu1 %v7624_v36  ;;  %v8188_v29 = vand.u32 4294901760, %v8187_v28 }
 0xc7b   :  { %10249 = vmatpush3.msra.mxu1 %v7636_v32  ;;  %10230 = vmatprep.mubr.msk.f32.mxu0 %vm11112_vm1, %v11111_v10  ;;  %v11773_v32 = vpack.c.bf16 %v8178_v14, %v8171_v13 }
 0xc7c   :  { %10233 = vmatprep.subr.mxu0 %v11111_v10  ;;  %10250 = vmatprep.mubr.msk.f32.mxu1 %vm11112_vm1, %v11111_v10 }
 0xc7d   :  { %10253 = vmatprep.subr.mxu1 %v11111_v10 }
 0xc81   :  { %10231 = vmatmul.mubr.f32.vlgmr.msra.gmra.mrb[16].mxu0 %v7172_v18 }
 0xc82   :  { %10234 = vmatpush3.msra.mxu0 %v7107_v24  ;;  %10251 = vmatmul.mubr.f32.vlgmr.msra.gmra.mrb[16].mxu1 %v7625_v38  ;;  %v8612_v38 = vld [vmem:[%s12082_s8 + $0x10] sm:$0xff] }
 0xc83   :  { %10254 = vmatpush3.msra.mxu1 %v11679_v7  ;;  %10235 = vmatprep.mubr.msk.f32.mxu0 %vm11112_vm1, %v11111_v10  ;;  %v8640_v42 = vand.u32 4294901760, %v8612_v38 }
 0xc84   :  { %10255 = vmatprep.mubr.msk.f32.mxu1 %vm11112_vm1, %v11111_v10  ;;  %10258 = vmatprep.subr.mxu1 %v11111_v10 }
 0xc85   :  { %10593 = vmatprep.subr.bf16.mxu0 %v11760_v8 }
 0xc89   :  { %10236 = vmatmul.mubr.f32.vlgmr.msra.gmra.mrb[16].mxu0 %v7172_v18  ;;  %v8180_v18 = vsub.f32 %v8178_v14, %v8179_v16  ;;  %v8620_v16 = vld [vmem:[%s12082_s8 + $0x50] sm:$0xff] }
 0xc8a   :  { %10256 = vmatmul.mubr.f32.vlgmr.msra.gmra.mrb[16].mxu1 %v7626_v39  ;;  %10595 = vmatpush3.bf16.msra.mxu0 %v11760_v8 }
 0xc8b   :  { %10259 = vmatpush3.msra.mxu1 %v7637_v37  ;;  %10260 = vmatprep.mubr.msk.f32.mxu1 %vm11112_vm1, %v11111_v10  ;;  %v8181_v22 = vand.u32 4294901760, %v8180_v18  ;;  %v8611_v37 = vld [vmem:[%s12082_s8 + $0x8] sm:$0xff]  ;;  %v8664_v18 = vand.u32 4294901760, %v8620_v16 }
 0xc8c   :  { %10263 = vmatprep.subr.mxu1 %v11111_v10  ;;  %v8637_v40 = vand.u32 4294901760, %v8611_v37 }
 0xc8d   :  { %v11768_v26 = vpack.c.bf16 %v8181_v22, %v8174_v21  ;;  %v11859_v22 = vsub.f32 %v8620_v16, %v8664_v18 }
 0xc92   :  { %10261 = vmatmul.mubr.f32.vlgmr.msra.gmra.mrb[16].mxu1 %v7624_v36 }
 0xc93   :  { %10264 = vmatpush3.msra.mxu1 %v11679_v7  ;;  %10265 = vmatprep.mubr.msk.f32.mxu1 %vm11112_vm1, %v11111_v10  ;;  %v8066_v7 = vld [vmem:[%s12080_s6 + $0x18] sm:$0xff] }
 0xc94   :  { %v8090_v27 = vand.u32 4294901760, %v8066_v7 }
 0xc96   :  { %v11762_v9 = vpack.c.bf16 %v8090_v27, %v8087_v25  ;;  %v8192_v20 = vsub.f32 %v8066_v7, %v8090_v27  ;;  %v8658_v7 = vand.u32 4294901760, %v8618_v11  ;;  %v8661_v25 = vand.u32 4294901760, %v8619_v6 }
 0xc98   :  { %10597 = vmatprep.subr.bf16.mxu0 %v11762_v9  ;;  %v8193_v24 = vand.u32 4294901760, %v8192_v20  ;;  %v11775_v33 = vpack.c.bf16 %v8192_v20, %v8185_v19  ;;  %v11841_v27 = vpack.c.bf16 %v8661_v25, %v8658_v7  ;;  %v11845_v14 = vsub.f32 %v8618_v11, %v8658_v7 }
 0xc99   :  { %10599 = vmatpush3.bf16.msra.mxu0 %v11762_v9  ;;  %v11847_v15 = vsub.f32 %v8619_v6, %v8661_v25  ;;  %v8667_v19 = vand.u32 4294901760, %v8621_v17 }
 0xc9a   :  { %10266 = vmatmul.mubr.f32.vlgmr.msra.gmra.mrb[16].mxu1 %v7624_v36  ;;  %v8194_v12 = vsub.f32 %v8192_v20, %v8193_v24  ;;  %10601 = vmatprep.subr.bf16.mxu0 %v11768_v26  ;;  %v11779_v35 = vpack.c.bf16 %v8193_v24, %v8186_v23  ;;  %v8610_v36 = vld [vmem:[%s12082_s8] sm:$0xff] }
 0xc9b   :  { %v8634_v39 = vand.u32 4294901760, %v8610_v36  ;;  %v11855_v20 = vpack.c.bf16 %v8667_v19, %v8664_v18  ;;  %v10720_v21 = vpack.c.bf16 %v11847_v15, %v11845_v14  ;;  %v11861_v23 = vsub.f32 %v8621_v17, %v8667_v19 }
 0xc9c   :  { %v8195_v30 = vand.u32 4294901760, %v8194_v12 }
 0xc9d   :  { %v10724_v24 = vpack.c.bf16 %v11861_v23, %v11859_v22 }
 0xc9e   :  { %v11771_v31 = vpack.c.bf16 %v8195_v30, %v8188_v29 }
 0xd5c   :  { %v7548_v44 = vpop.f32.mrb[16].mxu0 }
 0xd5d   :  { %8006 = vrot.lane.b32.xlu0 %v7548_v44, %s11126_s19  ;;  %v10237_v45 = vpop.f32.mrb[17].mxu0  ;;  %v8615_v44 = vld [vmem:[%s12082_s8 + $0x28] sm:$0xff] }
 0xd5e   :  { %v8643_v45 = vand.u32 4294901760, %v8613_v41 }
 0xd6d   :  { %v8000_v46 = vpop.f32.mrb[16].mxu1 }
 0xd6e   :  { %8008 = vrot.lane.b32.xlu1 %v8000_v46, %s11126_s19  ;;  %v10267_v48 = vpop.f32.mrb[17].mxu1  ;;  %v8646_v46 = vand.u32 4294901760, %v8614_v43 }
 0xd6f   :  { %v8649_v48 = vand.u32 4294901760, %v8615_v44 }
 0xdcf   :  { %v8007_v49 = vpop.permute.xlu0 %8006 }
 0xdd0   :  { %8013 = vst.msk [vmem:[#allocation2] sm:$0xff] %vm8012_vm6, %v8007_v49  ;;  %v11799_v49 = vpack.c.bf16 %v8637_v40, %v8634_v39 }
 0xdd7   :  { %v8015_v50 = vld [vmem:[#allocation2] sm:$0xff] }
 0xdd8   :  { %v11725_v52 = vadd.f32 %v11085_v51, %v8015_v50  ;;  %v11801_v50 = vsub.f32 %v8610_v36, %v8634_v39  ;;  %v11803_v51 = vsub.f32 %v8611_v37, %v8637_v40  ;;  %v9346_v36 = vld [vmem:[%s12078_s4] ss:$0 sm:$0xff] }
 0xdd9   :  { %v9347_v39 = vld [vmem:[%s12079_s5] ss:$0 sm:$0xff] }
 0xdda   :  { %v8019_v10 = vsel %vm38_vm0, %v11725_v52, 0.0 }
 0xddb   :  { %8020 = vadd.xlane.f32.xlu0 %v8019_v10  ;;  %v11805_v10 = vsub.f32 %v8612_v38, %v8640_v42 }
 0xde0   :  { %v8009_v53 = vpop.permute.xlu1 %8008 }
 0xde1   :  { %8014 = vst.msk [vmem:[#allocation2 + $0x8] sm:$0xff] %vm8012_vm6, %v8009_v53  ;;  %v11807_v53 = vpack.c.bf16 %v8643_v45, %v8640_v42 }
 0xde8   :  { %v8016_v54 = vld [vmem:[#allocation2 + $0x8] sm:$0xff] }
 0xde9   :  { %v11732_v56 = vadd.f32 %v11086_v55, %v8016_v54  ;;  %v11809_v54 = vsub.f32 %v8613_v41, %v8643_v45  ;;  %v11811_v55 = vpack.c.bf16 %v8649_v48, %v8646_v46 }
 0xdeb   :  { %v8022_v57 = vsel %vm38_vm0, %v11732_v56, 0.0 }
 0xdec   :  { %8023 = vadd.xlane.f32.xlu1 %v8022_v57  ;;  %v10704_v57 = vpack.c.bf16 %v11803_v51, %v11801_v50 }
 0xdee   :  { %10705 = vmatprep.subr.bf16.mxu1 %v10704_v57 }
 0xdef   :  { %10707 = vmatpush3.bf16.msra.mxu1 %v10704_v57 }
 0xe68   :  { %v8021_v58 = vpop.xlane.xlu0 %8020 }
 0xe69   :  { %v8025_v59 = vmul.f32 0.03125, %v8021_v58  ;;  %v11815_v58 = vsub.f32 %v8614_v43, %v8646_v46 }
 0xe6b   :  { %v11737_v60 = vsub.f32 %v11725_v52, %v8025_v59  ;;  %v11817_v59 = vsub.f32 %v8615_v44, %v8649_v48 }
 0xe6d   :  { %v8029_v61 = vmul.f32 %v11737_v60, %v11737_v60  ;;  %v10712_v3 = vpack.c.bf16 %v11817_v59, %v11815_v58 }
 0xe6f   :  { %v8031_v62 = vsel %vm38_vm0, %v8029_v61, 0.0  ;;  %v8616_v61 = vld [vmem:[%s12082_s8 + $0x30] sm:$0xff] }
 0xe70   :  { %8032 = vadd.xlane.f32.xlu0 %v8031_v62  ;;  %v8617_v62 = vld [vmem:[%s12082_s8 + $0x38] sm:$0xff] }
 0xe79   :  { %v8024_v63 = vpop.xlane.xlu1 %8023 }
 0xe7a   :  { %v8026_v0 = vmul.f32 0.03125, %v8024_v63  ;;  %v10708_v63 = vpack.c.bf16 %v11809_v54, %v11805_v10 }
 0xe7c   :  { %v11743_v1 = vsub.f32 %v11732_v56, %v8026_v0  ;;  %v8652_v0 = vand.u32 4294901760, %v8616_v61  ;;  %10709 = vmatprep.subr.bf16.mxu1 %v10708_v63 }
 0xe7d   :  { %10711 = vmatpush3.bf16.msra.mxu1 %v10708_v63 }
 0xe7e   :  { %v8030_v47 = vmul.f32 %v11743_v1, %v11743_v1  ;;  %v11831_v4 = vsub.f32 %v8616_v61, %v8652_v0  ;;  %10713 = vmatprep.subr.bf16.mxu1 %v10712_v3 }
 0xe80   :  { %v8034_v2 = vsel %vm38_vm0, %v8030_v47, 0.0  ;;  %v8655_v47 = vand.u32 4294901760, %v8617_v62 }
 0xe81   :  { %8035 = vadd.xlane.f32.xlu0 %v8034_v2  ;;  %10715 = vmatpush3.bf16.msra.mxu1 %v10712_v3 }
 0xe82   :  { %v11827_v2 = vpack.c.bf16 %v8655_v47, %v8652_v0  ;;  %v11833_v5 = vsub.f32 %v8617_v62, %v8655_v47 }
 0xe84   :  { %v10716_v13 = vpack.c.bf16 %v11833_v5, %v11831_v4 }
 0xe86   :  { %10717 = vmatprep.subr.bf16.mxu1 %v10716_v13 }
 0xe87   :  { %10719 = vmatpush3.bf16.msra.mxu1 %v10716_v13 }
 0xe88   :  { %10721 = vmatprep.subr.bf16.mxu1 %v10720_v21 }
 0xe8b   :  { %10723 = vmatpush3.bf16.msra.mxu1 %v10720_v21 }
 0xe8c   :  { %10725 = vmatprep.subr.bf16.mxu1 %v10724_v24 }
 0xe8f   :  { %10727 = vmatpush3.bf16.msra.mxu1 %v10724_v24  ;;  %v8737_v24 = vand.u32 4294901760, %v11801_v50 }
 0xefd   :  { %v8033_v28 = vpop.xlane.xlu0 %8032 }
 0xefe   :  { %v8037_v12 = vmul.f32 0.03125, %v8033_v28  ;;  %v8744_v28 = vand.u32 4294901760, %v11803_v51 }
 0xf00   :  { %v8039_v29 = vadd.f32 1e-05, %v8037_v12 }
 0xf02   :  { %11081 = vrsqrt.f32 %v8039_v29  ;;  %v8738_v29 = vsub.f32 %v11801_v50, %v8737_v24 }
 0xf0c   :  { %v11082_v30 = vpop.eup %11081 }
 0xf0d   :  { %v8043_v37 = vmul.f32 %v11082_v30, %v11737_v60  ;;  %v8745_v30 = vsub.f32 %v11803_v51, %v8744_v28 }
 0xf0e   :  { %v8036_v38 = vpop.xlane.xlu0 %8035 }
 0xf0f   :  { %v8038_v40 = vmul.f32 0.03125, %v8036_v38  ;;  %v8052_v41 = vmul.f32 %v9346_v36, %v8043_v37  ;;  %v8746_v37 = vand.u32 4294901760, %v8745_v30 }
 0xf11   :  { %v8040_v42 = vadd.f32 1e-05, %v8038_v40  ;;  %v8061_v43 = vadd.f32 %v9347_v39, %v8052_v41 }
 0xf13   :  { %11083 = vrsqrt.f32 %v8040_v42  ;;  %v8075_v44 = vsel %vm38_vm0, %v8061_v43, 0 }
 0xf14   :  { %v8149_v45 = vand.u32 4294901760, %v8075_v44 }
 0xf16   :  { %v8150_v46 = vsub.f32 %v8075_v44, %v8149_v45 }
 0xf18   :  { %v8151_v48 = vand.u32 4294901760, %v8150_v46 }
 0xf1a   :  { %v8152_v57 = vsub.f32 %v8150_v46, %v8151_v48 }
 0xf1c   :  { %v8153_v61 = vand.u32 4294901760, %v8152_v57  ;;  %v11936_v57 = vpack.c.bf16 %v8744_v28, %v8737_v24  ;;  %v8779_v28 = vand.u32 4294901760, %v11831_v4 }
 0xf1d   :  { %v11084_v62 = vpop.eup %11083 }
 0xf1e   :  { %v8044_v60 = vmul.f32 %v11084_v62, %v11743_v1  ;;  %10276 = vmatprep.mubr.f32.mxu0 %v8153_v61  ;;  %v8622_v1 = vld [vmem:[%s12082_s8 + $0x60] sm:$0xff] }
 0xf20   :  { %v8053_v63 = vmul.f32 %v9346_v36, %v8044_v60  ;;  %v8739_v36 = vand.u32 4294901760, %v8738_v29  ;;  %v8786_v29 = vand.u32 4294901760, %v11833_v5 }
 0xf22   :  { %v8062_v0 = vadd.f32 %v9347_v39, %v8053_v63  ;;  %v11931_v38 = vpack.c.bf16 %v8746_v37, %v8739_v36 }
 0xf24   :  { %v8078_v47 = vsel %vm38_vm0, %v8062_v0, 0 }
 0xf25   :  { %v8159_v3 = vand.u32 4294901760, %v8078_v47 }
 0xf27   :  { %v8160_v11 = vsub.f32 %v8078_v47, %v8159_v3  ;;  %v9348_v47 = vld [vmem:[%s12081_s7] ss:$0 sm:$0xff] }
 0xf29   :  { %v8161_v6 = vand.u32 4294901760, %v8160_v11 }
 0xf2b   :  { %v8162_v7 = vsub.f32 %v8160_v11, %v8161_v6 }
 0xf2d   :  { %v8163_v25 = vand.u32 4294901760, %v8162_v7 }
 0xf2f   :  { %10277 = vmatmul.mubr.f32.vlgmr.msra.gmra.mrb[18].mxu0 %v8163_v25 }
 0xf30   :  { %10603 = vmatpush3.bf16.msra.mxu0 %v11768_v26  ;;  %10287 = vmatprep.mubr.f32.mxu0 %v8149_v45 }
 0xf31   :  { %10605 = vmatprep.subr.bf16.mxu0 %v11771_v31 }
 0xf34   :  { %10607 = vmatpush3.bf16.msra.mxu0 %v11771_v31 }
 0xf35   :  { %10609 = vmatprep.subr.bf16.mxu0 %v11773_v32 }
 0xf37   :  { %10288 = vmatmul.mubr.f32.vlgmr.msra.gmra.mrb[18].mxu0 %v8159_v3 }
 0xf38   :  { %10611 = vmatpush3.bf16.msra.mxu0 %v11773_v32  ;;  %10298 = vmatprep.mubr.f32.mxu0 %v8150_v46 }
 0xf39   :  { %10613 = vmatprep.subr.bf16.mxu0 %v11775_v33 }
 0xf3c   :  { %10615 = vmatpush3.bf16.msra.mxu0 %v11775_v33  ;;  %v8624_v33 = vld [vmem:[%s12082_s8 + $0x70] sm:$0xff] }
 0xf3d   :  { %10617 = vmatprep.subr.bf16.mxu0 %v11760_v8  ;;  %v8676_v13 = vand.u32 4294901760, %v8624_v33 }
 0xf3f   :  { %10299 = vmatmul.mubr.f32.vlgmr.msra.gmra.mrb[18].mxu0 %v8160_v11  ;;  %v8834_v17 = vsub.f32 %v8624_v33, %v8676_v13  ;;  %v8772_v33 = vand.u32 4294901760, %v11817_v59 }
 0xf40   :  { %10619 = vmatpush3.bf16.msra.mxu0 %v11760_v8  ;;  %10309 = vmatprep.mubr.f32.mxu0 %v8151_v48 }
 0xf41   :  { %10621 = vmatprep.subr.bf16.mxu0 %v11762_v9  ;;  %v8773_v24 = vsub.f32 %v11817_v59, %v8772_v33 }
 0xf44   :  { %10623 = vmatpush3.bf16.msra.mxu0 %v11762_v9 }
 0xf45   :  { %10625 = vmatprep.subr.bf16.mxu0 %v11777_v34 }
 0xf47   :  { %10310 = vmatmul.mubr.f32.vlgmr.msra.gmra.mrb[18].mxu0 %v8161_v6 }
 0xf48   :  { %10627 = vmatpush3.bf16.msra.mxu0 %v11777_v34  ;;  %10320 = vmatprep.mubr.f32.mxu0 %v8149_v45  ;;  %v8625_v34 = vld [vmem:[%s12082_s8 + $0x78] sm:$0xff] }
 0xf49   :  { %10629 = vmatprep.subr.bf16.mxu0 %v11779_v35  ;;  %v8679_v16 = vand.u32 4294901760, %v8625_v34 }
 0xf4b   :  { %v8841_v18 = vsub.f32 %v8625_v34, %v8679_v16  ;;  %v11925_v12 = vpack.c.bf16 %v8679_v16, %v8676_v13 }
 0xf4c   :  { %10631 = vmatpush3.bf16.msra.mxu0 %v11779_v35 }
 0xf4d   :  { %10633 = vmatprep.subr.bf16.mxu0 %v11760_v8  ;;  %v10732_v19 = vpack.c.bf16 %v8841_v18, %v8834_v17  ;;  %v8842_v50 = vand.u32 4294901760, %v8841_v18 }
 0xf4f   :  { %10321 = vmatmul.mubr.f32.vlgmr.msra.gmra.mrb[18].mxu0 %v8159_v3  ;;  %v8843_v48 = vsub.f32 %v8841_v18, %v8842_v50 }
 0xf50   :  { %10635 = vmatpush3.bf16.msra.mxu0 %v11760_v8  ;;  %10331 = vmatprep.mubr.f32.mxu0 %v8149_v45  ;;  %v8623_v8 = vld [vmem:[%s12082_s8 + $0x68] sm:$0xff]  ;;  %v8835_v45 = vand.u32 4294901760, %v8834_v17 }
 0xf51   :  { %10637 = vmatprep.subr.bf16.mxu0 %v11762_v9  ;;  %v8673_v26 = vand.u32 4294901760, %v8623_v8  ;;  %v8844_v62 = vand.u32 4294901760, %v8843_v48  ;;  %v8800_v48 = vand.u32 4294901760, %v11847_v15 }
 0xf52   :  { %v8836_v51 = vsub.f32 %v8834_v17, %v8835_v45  ;;  %v11942_v0 = vpack.c.bf16 %v8842_v50, %v8835_v45 }
 0xf53   :  { %v8827_v32 = vsub.f32 %v8623_v8, %v8673_v26  ;;  %v8758_v8 = vand.u32 4294901760, %v11809_v54 }
 0xf54   :  { %10639 = vmatpush3.bf16.msra.mxu0 %v11762_v9  ;;  %v8670_v9 = vand.u32 4294901760, %v8622_v1  ;;  %v8837_v61 = vand.u32 4294901760, %v8836_v51  ;;  %v8793_v51 = vand.u32 4294901760, %v11845_v14 }
 0xf55   :  { %10641 = vmatprep.subr.bf16.mxu0 %v11799_v49  ;;  %v8828_v40 = vand.u32 4294901760, %v8827_v32  ;;  %v8759_v13 = vsub.f32 %v11809_v54, %v8758_v8  ;;  %v10780_v54 = vpack.c.bf16 %v8786_v29, %v8779_v28 }
 0xf56   :  { %v8820_v31 = vsub.f32 %v8622_v1, %v8670_v9  ;;  %v11918_v21 = vpack.c.bf16 %v8673_v26, %v8670_v9  ;;  %v11938_v60 = vpack.c.bf16 %v8844_v62, %v8837_v61  ;;  %v8751_v1 = vand.u32 4294901760, %v11805_v10 }
 0xf57   :  { %10332 = vmatmul.mubr.f32.vlgmr.msra.gmra.mrb[18].mxu0 %v8159_v3  ;;  %v8829_v42 = vsub.f32 %v8827_v32, %v8828_v40  ;;  %v8760_v37 = vand.u32 4294901760, %v8759_v13 }
 0xf58   :  { %10643 = vmatpush3.bf16.msra.mxu0 %v11799_v49  ;;  %v10728_v35 = vpack.c.bf16 %v8827_v32, %v8820_v31  ;;  %v8821_v39 = vand.u32 4294901760, %v8820_v31 }
 0xf59   :  { %10645 = vmatprep.subr.bf16.mxu0 %v11807_v53  ;;  %v8830_v44 = vand.u32 4294901760, %v8829_v42  ;;  %v8774_v42 = vand.u32 4294901760, %v8773_v24 }
 0xf5a   :  { %10729 = vmatprep.subr.bf16.mxu1 %v10728_v35  ;;  %v8822_v41 = vsub.f32 %v8820_v31, %v8821_v39  ;;  %v11940_v63 = vpack.c.bf16 %v8828_v40, %v8821_v39  ;;  %v8765_v31 = vand.u32 4294901760, %v11815_v58 }
 0xf5b   :  { %10731 = vmatpush3.bf16.msra.mxu1 %v10728_v35  ;;  %v8752_v35 = vsub.f32 %v11805_v10, %v8751_v1 }
 0xf5c   :  { %10647 = vmatpush3.bf16.msra.mxu0 %v11807_v53  ;;  %10733 = vmatprep.subr.bf16.mxu1 %v10732_v19  ;;  %v8823_v43 = vand.u32 4294901760, %v8822_v41  ;;  %v8766_v18 = vsub.f32 %v11815_v58, %v8765_v31  ;;  %v10776_v10 = vpack.c.bf16 %v8772_v33, %v8765_v31 }
 0xf5d   :  { %10649 = vmatprep.subr.bf16.mxu0 %v11811_v55  ;;  %v8753_v36 = vand.u32 4294901760, %v8752_v35 }
 0xf5e   :  { %v11934_v46 = vpack.c.bf16 %v8830_v44, %v8823_v43  ;;  %v8767_v40 = vand.u32 4294901760, %v8766_v18  ;;  %v8780_v43 = vsub.f32 %v11831_v4, %v8779_v28  ;;  %v8787_v44 = vsub.f32 %v11833_v5, %v8786_v29 }
 0xf5f   :  { %10735 = vmatpush3.bf16.msra.mxu1 %v10732_v19  ;;  %v10676_v50 = vpack.c.bf16 %v8760_v37, %v8753_v36 }
 0xf60   :  { %10651 = vmatpush3.bf16.msra.mxu0 %v11811_v55  ;;  %10737 = vmatprep.subr.bf16.mxu1 %v11799_v49  ;;  %v10680_v61 = vpack.c.bf16 %v8774_v42, %v8767_v40  ;;  %v8781_v62 = vand.u32 4294901760, %v8780_v43 }
 0xf61   :  { %10653 = vmatprep.subr.bf16.mxu0 %v11827_v2 }
 0xf64   :  { %10655 = vmatpush3.bf16.msra.mxu0 %v11827_v2 }
 0xf65   :  { %10657 = vmatprep.subr.bf16.mxu0 %v11841_v27 }
 0xf68   :  { %10659 = vmatpush3.bf16.msra.mxu0 %v11841_v27 }
 0xf69   :  { %10661 = vmatprep.subr.bf16.mxu0 %v11855_v20 }
 0xf6c   :  { %10663 = vmatpush3.bf16.msra.mxu0 %v11855_v20 }
 0xf6d   :  { %10665 = vmatprep.subr.bf16.mxu0 %v11918_v21 }
 0xf70   :  { %10667 = vmatpush3.bf16.msra.mxu0 %v11918_v21 }
 0xf71   :  { %10669 = vmatprep.subr.bf16.mxu0 %v11925_v12 }
 0xf74   :  { %10671 = vmatpush3.bf16.msra.mxu0 %v11925_v12 }
 0xf75   :  { %10673 = vmatprep.subr.bf16.mxu0 %v11931_v38 }
0x102a   :  { %v10333_v3 = vpop.f32.mrb[18].mxu0 }
0x102b   :  { %v10833_v11 = vadd.f32 %v10333_v3, %v9348_v47  ;;  %v8598_v6 = vpop.f32.mrb[19].mxu0  ;;  %v8794_v3 = vsub.f32 %v11845_v14, %v8793_v51 }
0x102c   :  { %v10834_v7 = vadd.f32 %v9348_v47, %v8598_v6  ;;  %v8788_v47 = vand.u32 4294901760, %v8787_v44  ;;  %v8807_v6 = vand.u32 4294901760, %v11859_v22 }
0x102d   :  { %v8609_v25 = vmax.f32 %v10833_v11, 0.0  ;;  %v8801_v11 = vsub.f32 %v11847_v15, %v8800_v48 }
0x102e   :  { %v8608_v9 = vmax.f32 %v10834_v7, 0.0  ;;  %v8814_v7 = vand.u32 4294901760, %v11861_v23  ;;  %v8808_v35 = vsub.f32 %v11859_v22, %v8807_v6  ;;  %v10772_v22 = vpack.c.bf16 %v8758_v8, %v8751_v1 }
0x102f   :  { %v11949_v26 = vand.u32 4294901760, %v8609_v25 }
0x1030   :  { %v11952_v32 = vand.u32 4294901760, %v8608_v9  ;;  %v8815_v13 = vsub.f32 %v11861_v23, %v8814_v7  ;;  %v8809_v15 = vand.u32 4294901760, %v8808_v35  ;;  %v10784_v23 = vpack.c.bf16 %v8800_v48, %v8793_v51 }
0x1031   :  { %v11956_v34 = vsub.f32 %v8609_v25, %v11949_v26  ;;  %v8795_v25 = vand.u32 4294901760, %v8794_v3  ;;  %v10788_v58 = vpack.c.bf16 %v8814_v7, %v8807_v6 }
0x1032   :  { %v8715_v16 = vsub.f32 %v8608_v9, %v11952_v32  ;;  %v8802_v9 = vand.u32 4294901760, %v8801_v11 }
0x1033   :  { %v8726_v17 = vand.u32 4294901760, %v11956_v34 }
0x1034   :  { %10436 = vmatprep.mubr.f32.mxu1 %v8715_v16  ;;  %v8716_v19 = vand.u32 4294901760, %v8715_v16  ;;  %v10688_v14 = vpack.c.bf16 %v8802_v9, %v8795_v25 }
0x1035   :  { %v8727_v30 = vsub.f32 %v11956_v34, %v8726_v17  ;;  %10437 = vmatmul.mubr.f32.vlgmr.msra.gmra.mrb[18].mxu1 %v11956_v34 }
0x1036   :  { %10739 = vmatpush3.bf16.msra.mxu1 %v11799_v49  ;;  %10471 = vmatprep.mubr.f32.mxu1 %v8716_v19  ;;  %v8717_v39 = vsub.f32 %v8715_v16, %v8716_v19  ;;  %v8816_v16 = vand.u32 4294901760, %v8815_v13 }
0x1037   :  { %10741 = vmatprep.subr.bf16.mxu1 %v11807_v53  ;;  %v8728_v45 = vand.u32 4294901760, %v8727_v30 }
0x1038   :  { %v8718_v41 = vand.u32 4294901760, %v8717_v39  ;;  %v10692_v18 = vpack.c.bf16 %v8816_v16, %v8809_v15 }
0x103a   :  { %10743 = vmatpush3.bf16.msra.mxu1 %v11807_v53  ;;  %10366 = vmatprep.mubr.f32.mxu0 %v8718_v41 }
0x103b   :  { %10367 = vmatmul.mubr.f32.vlgmr.msra.gmra.mrb[20].mxu0 %v8728_v45  ;;  %10745 = vmatprep.subr.bf16.mxu1 %v11811_v55 }
0x103c   :  { %10675 = vmatpush3.bf16.msra.mxu0 %v11931_v38  ;;  %10401 = vmatprep.mubr.f32.mxu0 %v11952_v32  ;;  %v10684_v38 = vpack.c.bf16 %v8788_v47, %v8781_v62 }
0x103d   :  { %10677 = vmatprep.subr.bf16.mxu0 %v10676_v50 }
0x103e   :  { %10747 = vmatpush3.bf16.msra.mxu1 %v11811_v55 }
0x103f   :  { %10749 = vmatprep.subr.bf16.mxu1 %v11827_v2 }
0x1040   :  { %10679 = vmatpush3.bf16.msra.mxu0 %v10676_v50 }
0x1041   :  { %10681 = vmatprep.subr.bf16.mxu0 %v10680_v61 }
0x1042   :  { %10751 = vmatpush3.bf16.msra.mxu1 %v11827_v2 }
0x1043   :  { %10753 = vmatprep.subr.bf16.mxu1 %v11841_v27 }
0x1044   :  { %10683 = vmatpush3.bf16.msra.mxu0 %v10680_v61 }
0x1045   :  { %10685 = vmatprep.subr.bf16.mxu0 %v10684_v38 }
0x1046   :  { %10755 = vmatpush3.bf16.msra.mxu1 %v11841_v27 }
0x1047   :  { %10757 = vmatprep.subr.bf16.mxu1 %v11855_v20 }
0x1048   :  { %10687 = vmatpush3.bf16.msra.mxu0 %v10684_v38 }
0x1049   :  { %10689 = vmatprep.subr.bf16.mxu0 %v10688_v14 }
0x104a   :  { %10759 = vmatpush3.bf16.msra.mxu1 %v11855_v20 }
0x104b   :  { %10761 = vmatprep.subr.bf16.mxu1 %v11918_v21 }
0x104c   :  { %10691 = vmatpush3.bf16.msra.mxu0 %v10688_v14 }
0x104d   :  { %10693 = vmatprep.subr.bf16.mxu0 %v10692_v18 }
0x104e   :  { %10763 = vmatpush3.bf16.msra.mxu1 %v11918_v21 }
0x104f   :  { %10765 = vmatprep.subr.bf16.mxu1 %v11925_v12 }
0x1050   :  { %10695 = vmatpush3.bf16.msra.mxu0 %v10692_v18 }
0x1051   :  { %10697 = vmatprep.subr.bf16.mxu0 %v11934_v46 }
0x1052   :  { %10767 = vmatpush3.bf16.msra.mxu1 %v11925_v12 }
0x1053   :  { %10769 = vmatprep.subr.bf16.mxu1 %v11936_v57 }
0x1054   :  { %10699 = vmatpush3.bf16.msra.mxu0 %v11934_v46 }
0x1055   :  { %10472 = vmatmul.mubr.f32.vlgmr.msra.gmra.mrb[18].mxu1 %v8726_v17  ;;  %10701 = vmatprep.subr.bf16.mxu0 %v11938_v60 }
0x1056   :  { %10771 = vmatpush3.bf16.msra.mxu1 %v11936_v57  ;;  %10506 = vmatprep.mubr.f32.mxu1 %v11952_v32 }
0x1057   :  { %10773 = vmatprep.subr.bf16.mxu1 %v10772_v22 }
0x1058   :  { %10703 = vmatpush3.bf16.msra.mxu0 %v11938_v60 }
0x105a   :  { %10775 = vmatpush3.bf16.msra.mxu1 %v10772_v22 }
0x105b   :  { %10402 = vmatmul.mubr.f32.vlgmr.msra.gmra.mrb[20].mxu0 %v11949_v26  ;;  %10777 = vmatprep.subr.bf16.mxu1 %v10776_v10 }
0x105e   :  { %10779 = vmatpush3.bf16.msra.mxu1 %v10776_v10 }
0x105f   :  { %10781 = vmatprep.subr.bf16.mxu1 %v10780_v54 }
0x1062   :  { %10783 = vmatpush3.bf16.msra.mxu1 %v10780_v54 }
0x1063   :  { %10785 = vmatprep.subr.bf16.mxu1 %v10784_v23 }
0x1066   :  { %10787 = vmatpush3.bf16.msra.mxu1 %v10784_v23 }
0x1067   :  { %10789 = vmatprep.subr.bf16.mxu1 %v10788_v58 }
0x106a   :  { %10791 = vmatpush3.bf16.msra.mxu1 %v10788_v58 }
0x106b   :  { %10793 = vmatprep.subr.bf16.mxu1 %v11940_v63 }
0x106e   :  { %10795 = vmatpush3.bf16.msra.mxu1 %v11940_v63 }
0x106f   :  { %10797 = vmatprep.subr.bf16.mxu1 %v11942_v0 }
0x1072   :  { %10799 = vmatpush3.bf16.msra.mxu1 %v11942_v0 }
0x1073   :  { %10801 = vmatprep.subr.bf16.mxu1 %v11799_v49 }
0x1075   :  { %10507 = vmatmul.mubr.f32.vlgmr.msra.gmra.mrb[18].mxu1 %v11949_v26 }
0x1076   :  { %10803 = vmatpush3.bf16.msra.mxu1 %v11799_v49  ;;  %10541 = vmatprep.mubr.f32.mxu1 %v11952_v32 }
0x1077   :  { %10805 = vmatprep.subr.bf16.mxu1 %v11807_v53 }
0x107a   :  { %10807 = vmatpush3.bf16.msra.mxu1 %v11807_v53 }
0x107b   :  { %10809 = vmatprep.subr.bf16.mxu1 %v11811_v55 }
0x107e   :  { %10811 = vmatpush3.bf16.msra.mxu1 %v11811_v55  ;;  %v9349_v55 = vld [vmem:[%s12083_s9] ss:$0 sm:$0xff]  ;;  %s11087_s9 = scalar_lea.vmem %s9334_s21, 256 }
0x107f   :  { %10813 = vmatprep.subr.bf16.mxu1 %v11827_v2  ;;  %p11088_p0 = scmp.ne.s32.totalorder %s9334_s21, %s11087_s9  ;;  %p11093_p2 = scmp.lt.s32.totalorder %s11087_s9, %s11087_s9 }
0x1081   :  { %p11094_p3 = por %p11093_p2, %p11092_p1 }
0x1082   :  { %10815 = vmatpush3.bf16.msra.mxu1 %v11827_v2 }
0x1083   :  { %10817 = vmatprep.subr.bf16.mxu1 %v11841_v27  ;;  %p11095_p4 = pnand %p11094_p3, %p11088_p0 }
0x1086   :  { %10819 = vmatpush3.bf16.msra.mxu1 %v11841_v27 }
0x1087   :  { %10821 = vmatprep.subr.bf16.mxu1 %v11855_v20 }
0x108a   :  { %10823 = vmatpush3.bf16.msra.mxu1 %v11855_v20 }
0x108b   :  { %10825 = vmatprep.subr.bf16.mxu1 %v11918_v21 }
0x108e   :  { %10827 = vmatpush3.bf16.msra.mxu1 %v11918_v21 }
0x108f   :  { %10829 = vmatprep.subr.bf16.mxu1 %v11925_v12 }
0x1092   :  { %10831 = vmatpush3.bf16.msra.mxu1 %v11925_v12 }
0x1095   :  { %10542 = vmatmul.mubr.f32.vlgmr.msra.gmra.mrb[18].mxu1 %v11949_v26 }
0x112e   :  { %v10403_v49 = vpop.f32.mrb[20].mxu0 }
0x112f   :  { %v8881_v53 = vpop.f32.mrb[21].mxu0  ;;  %v10835_v59 = vadd.f32 %v10403_v49, %v9349_v55 }
0x1130   :  { %v10837_v2 = vadd.f32 %v9349_v55, %v8881_v53 }
0x1168   :  { %v10543_v4 = vpop.f32.mrb[18].mxu1 }
0x1169   :  { %v10836_v5 = vadd.f32 %v10835_v59, %v10543_v4  ;;  %v9307_v27 = vpop.f32.mrb[19].mxu1 }
0x116a   :  { %v10838_v20 = vadd.f32 %v10837_v2, %v9307_v27 }
0x116b   :  { %v9318_v21 = vadd.f32 %v10836_v5, %v11732_v56 }
0x116c   :  { %v9317_v46 = vadd.f32 %v10838_v20, %v11725_v52 }
0x116d   :  { %v9320_v57 = vmul.f32 10000.0, %v9318_v21 }
0x116e   :  { %v9319_v12 = vmul.f32 10000.0, %v9317_v46 }
0x116f   :  { %v11026_v60 = vround.rtne.f32 %v9320_v57 }
0x1170   :  { %v11025_v63 = vround.rtne.f32 %v9319_v12 }
0x1171   :  { %v9325_v0 = vmul.f32 0.0001, %v11026_v60 }
0x1172   :  { %v9324_v1 = vmul.f32 0.0001, %v11025_v63 }
0x1173   :  { %9327 = vst.msk [vmem:[#allocation3 + $0x8] sm:$0xff] %vm38_vm0, %v9325_v0 }
0x1174   :  { %9326 = vst.msk [vmem:[#allocation3] sm:$0xff] %vm38_vm0, %v9324_v1 }
0x1175   :  { %11098 = shalt.err (!%p11095_p4)
}
0x1176   :  { %s11099_s0 = scalar_lea.hbm %s12084_s10, 256 }
0x1177   :  { %p11100_p5 = scmp.ne.s32.totalorder %s12084_s10, %s11099_s0  ;;  %p11103_p6 = scmp.lt.u32.totalorder %s11099_s0, %s12084_s10 }
0x1179   :  { %p11105_p7 = pnand %p11103_p6, %p11100_p5 }
0x117b   :  { %11108 = shalt.err (!%p11105_p7)
}
0x117c   :  { %s11128_s27 = smov 128  }
0x117d   :  { %9339 = dma.vmem_to_hbm [thread:$0]  %s9334_s21, 256, %s12084_s10, [#allocation4], %s11128_s27, %s11128_s27, %s11124_s17  }
0x117e   :  { %11109 = dma.done.wait [#allocation4], 256  }
0x117f   :  { %11110 = vsyncadd [#allocation4], 4294967040 }
0x1180   :  { %9343 = vsyncpa [#allocation4], 1 }

</bundles_post_ra>
